<compile_context>
chip_gen: v7x
topology: tpu7x:2x2x1
jax: 0.10.0
libtpu: 0.0.40
codegen_flags: <defaults>
</compile_context>

<pallas_src>
import jax
import jax.numpy as jnp
from jax import lax
from jax.experimental import pallas as pl
from jax.experimental.pallas import tpu as pltpu

EPS = 1e-5
LANE = 128
MAX_TM = 512
_VMEM_LIMIT = 32 * 1024 * 1024


def _round_up(x, m):
    return ((x + m - 1) // m) * m


def _pad2d(a, rows, cols):
    r = 0 if rows is None else rows - a.shape[0]
    c = 0 if cols is None else cols - a.shape[1]
    if r or c:
        a = jnp.pad(a, ((0, r), (0, c)))
    return a


def _pad1d(a, n):
    if a.shape[0] != n:
        a = jnp.pad(a, (0, n - a.shape[0]))
    return a


# ----------------------- phase 1: conv matmul + stats -----------------------

def _conv_stats_kernel(p_ref, w_ref, out_ref, stats_ref):
    # bf16 x bf16 -> f32 on the MXU.
    acc = jnp.dot(p_ref[...], w_ref[...], preferred_element_type=jnp.float32)
    out_ref[...] = acc.astype(out_ref.dtype)
    s = jnp.sum(acc, axis=0, keepdims=True)          # (1, Cp) partial sum
    q = jnp.sum(acc * acc, axis=0, keepdims=True)    # (1, Cp) partial sum-of-squares
    row = lax.broadcasted_iota(jnp.int32, stats_ref.shape, 0)
    stats_ref[...] = jnp.where(row == 0, s, 0.0) + jnp.where(row == 1, q, 0.0)


def conv_stats(patches_p, w_p, tm):
    """(Mp,K)bf16 @ (K,Cp)bf16 -> bf16 conv out + per-channel sum/sumsq (f32)."""
    Mp, K = patches_p.shape
    Cp = w_p.shape[1]
    n_tiles = Mp // tm
    out, stats = pl.pallas_call(
        _conv_stats_kernel,
        grid=(n_tiles,),
        in_specs=[
            pl.BlockSpec((tm, K), lambda m: (m, 0)),
            pl.BlockSpec((K, Cp), lambda m: (0, 0)),
        ],
        out_specs=[
            pl.BlockSpec((tm, Cp), lambda m: (m, 0)),
            pl.BlockSpec((8, Cp), lambda m: (m, 0)),
        ],
        out_shape=[
            jax.ShapeDtypeStruct((Mp, Cp), jnp.bfloat16),
            jax.ShapeDtypeStruct((n_tiles * 8, Cp), jnp.float32),
        ],
        compiler_params=pltpu.CompilerParams(
            dimension_semantics=("parallel",),
            vmem_limit_bytes=_VMEM_LIMIT),
    )(patches_p, w_p)
    stats = stats.reshape(n_tiles, 8, Cp)
    return out, jnp.sum(stats[:, 0, :], axis=0), jnp.sum(stats[:, 1, :], axis=0)


def bn_scale_shift(s, q, count, gamma, beta, Cp):
    """Fold training-mode BatchNorm (batch mean, biased var) into scale/shift."""
    mean = s / count
    var = jnp.maximum(q / count - mean * mean, 0.0)
    g = _pad1d(gamma.astype(jnp.float32), Cp)
    b = _pad1d(beta.astype(jnp.float32), Cp)
    scale = g * lax.rsqrt(var + EPS)
    shift = b - mean * scale
    return scale, shift


# -------------------- phase 2: scale/shift (+res) (+relu) -------------------

def _make_bn_apply_kernel(has_residual, relu):
    def _compute(x_ref, s_ref, b_ref, r_ref, rs_ref, rb_ref, o_ref):
        y = x_ref[...].astype(jnp.float32) * s_ref[...] + b_ref[...]
        if r_ref is not None:
            y = y + r_ref[...].astype(jnp.float32) * rs_ref[...] + rb_ref[...]
        if relu:
            y = jnp.maximum(y, 0.0)
        o_ref[...] = y.astype(o_ref.dtype)

    if has_residual:
        def kernel(x_ref, s_ref, b_ref, r_ref, rs_ref, rb_ref, o_ref):
            _compute(x_ref, s_ref, b_ref, r_ref, rs_ref, rb_ref, o_ref)
    else:
        def kernel(x_ref, s_ref, b_ref, o_ref):
            _compute(x_ref, s_ref, b_ref, None, None, None, o_ref)
    return kernel


def bn_apply(x_p, scale, shift, tm, residual=None, r_scale=None, r_shift=None,
             relu=True, out_dtype=jnp.bfloat16):
    Mp, Cp = x_p.shape
    n_tiles = Mp // tm
    args = [x_p, scale.reshape(1, Cp).astype(jnp.float32),
            shift.reshape(1, Cp).astype(jnp.float32)]
    in_specs = [
        pl.BlockSpec((tm, Cp), lambda m: (m, 0)),
        pl.BlockSpec((1, Cp), lambda m: (0, 0)),
        pl.BlockSpec((1, Cp), lambda m: (0, 0)),
    ]
    if residual is not None:
        args += [residual, r_scale.reshape(1, Cp).astype(jnp.float32),
                 r_shift.reshape(1, Cp).astype(jnp.float32)]
        in_specs += [
            pl.BlockSpec((tm, Cp), lambda m: (m, 0)),
            pl.BlockSpec((1, Cp), lambda m: (0, 0)),
            pl.BlockSpec((1, Cp), lambda m: (0, 0)),
        ]
    kernel = _make_bn_apply_kernel(residual is not None, relu)
    return pl.pallas_call(
        kernel,
        grid=(n_tiles,),
        in_specs=in_specs,
        out_specs=pl.BlockSpec((tm, Cp), lambda m: (m, 0)),
        out_shape=jax.ShapeDtypeStruct((Mp, Cp), out_dtype),
        compiler_params=pltpu.CompilerParams(
            dimension_semantics=("parallel",),
            vmem_limit_bytes=_VMEM_LIMIT),
    )(*args)


# ------------------------- plain-JAX glue (layout) ---------------------------

def im2col_3x3(x_nhwc, stride):
    """3x3 / pad=1 patch extraction -> (N*Ho*Wo, 9*C) in the input's dtype."""
    N, H, W, C = x_nhwc.shape
    xp = jnp.pad(x_nhwc, ((0, 0), (1, 1), (1, 1), (0, 0)))
    Ho = (H + 2 - 3) // stride + 1
    Wo = (W + 2 - 3) // stride + 1
    cols = []
    for dy in range(3):
        for dx in range(3):
            v = xp[:, dy:dy + stride * (Ho - 1) + 1:stride,
                      dx:dx + stride * (Wo - 1) + 1:stride, :]
            cols.append(v)
    patches = jnp.stack(cols, axis=3)          # (N, Ho, Wo, 9, C), tap order (dy, dx)
    return patches.reshape(N * Ho * Wo, 9 * C), (N, Ho, Wo)


def conv3x3_weight_to_mat(w):
    """(Cout, Cin, 3, 3) PyTorch weight -> (9*Cin, Cout) matmul weight."""
    Cout, Cin, _, _ = w.shape
    return jnp.transpose(w, (2, 3, 1, 0)).reshape(9 * Cin, Cout)


# ------------------------------- BasicBlock ----------------------------------

def init_basic_block(key, in_planes, planes, stride):
    k1, k2, k3 = jax.random.split(key, 3)

    def kaiming(k, shape, fan_in):
        return jax.random.normal(k, shape, jnp.float32) * (2.0 / fan_in) ** 0.5

    params = {
        "w1": kaiming(k1, (planes, in_planes, 3, 3), in_planes * 9),
        "g1": jnp.ones((planes,), jnp.float32),
        "b1": jnp.zeros((planes,), jnp.float32),
        "w2": kaiming(k2, (planes, planes, 3, 3), planes * 9),
        "g2": jnp.ones((planes,), jnp.float32),
        "b2": jnp.zeros((planes,), jnp.float32),
    }
    if stride != 1 or in_planes != planes:
        params["wsc"] = kaiming(k3, (planes, in_planes, 1, 1), in_planes)
        params["gsc"] = jnp.ones((planes,), jnp.float32)
        params["bsc"] = jnp.zeros((planes,), jnp.float32)
    return params


def basic_block_forward(x_nchw, params, stride):
    in_planes = x_nchw.shape[1]
    planes = params["w1"].shape[0]
    Cp = _round_up(planes, LANE)

    # NCHW -> NHWC, bf16 activations everywhere inside the block.
    x = jnp.transpose(x_nchw, (0, 2, 3, 1)).astype(jnp.bfloat16)

    # conv1 (3x3, stride) + per-channel stats
    p1, (N, Ho, Wo) = im2col_3x3(x, stride)
    M = N * Ho * Wo
    tm = min(MAX_TM, _round_up(M, 8))
    Mp = _round_up(M, tm)
    p1 = _pad2d(p1, Mp, None)
    w1 = _pad2d(conv3x3_weight_to_mat(params["w1"]).astype(jnp.bfloat16), None, Cp)
    c1, s1, q1 = conv_stats(p1, w1, tm)
    scale1, shift1 = bn_scale_shift(s1, q1, M, params["g1"], params["b1"], Cp)

    # bn1 + relu
    out1 = bn_apply(c1, scale1, shift1, tm, relu=True, out_dtype=jnp.bfloat16)

    # shortcut branch (BN folded into residual scale/shift for the final kernel)
    if "wsc" in params:
        xs = _pad2d(x[:, ::stride, ::stride, :].reshape(M, in_planes), Mp, None)
        wsc = _pad2d(params["wsc"][:, :, 0, 0].T.astype(jnp.bfloat16), None, Cp)
        residual, ssc, qsc = conv_stats(xs, wsc, tm)
        r_scale, r_shift = bn_scale_shift(ssc, qsc, M, params["gsc"], params["bsc"], Cp)
    else:
        residual = _pad2d(x.reshape(M, in_planes), Mp, Cp)
        r_scale = jnp.ones((Cp,), jnp.float32)
        r_shift = jnp.zeros((Cp,), jnp.float32)

    # conv2 (3x3, stride 1) + per-channel stats
    out1_nhwc = out1[:M, :planes].reshape(N, Ho, Wo, planes)
    p2, _ = im2col_3x3(out1_nhwc, 1)
    p2 = _pad2d(p2, Mp, None)
    w2 = _pad2d(conv3x3_weight_to_mat(params["w2"]).astype(jnp.bfloat16), None, Cp)
    c2, s2, q2 = conv_stats(p2, w2, tm)
    scale2, shift2 = bn_scale_shift(s2, q2, M, params["g2"], params["b2"], Cp)

    # bn2 + shortcut(-BN) add + relu, fused in one kernel; final result in f32
    out = bn_apply(c2, scale2, shift2, tm,
                   residual=residual, r_scale=r_scale, r_shift=r_shift,
                   relu=True, out_dtype=jnp.float32)

    out = out[:M, :planes].reshape(N, Ho, Wo, planes)
    return jnp.transpose(out, (0, 3, 1, 2))                        # NHWC -> NCHW


# ------------------------------ f32 reference ---------------------------------

def reference_forward(x, params, stride):
    def conv3(x, w, s):
        return lax.conv_general_dilated(x, w, (s, s), ((1, 1), (1, 1)),
                                        dimension_numbers=("NCHW", "OIHW", "NCHW"))

    def bn(x, g, b):
        mean = jnp.mean(x, axis=(0, 2, 3), keepdims=True)
        var = jnp.mean((x - mean) ** 2, axis=(0, 2, 3), keepdims=True)
        return ((x - mean) * lax.rsqrt(var + EPS) * g.reshape(1, -1, 1, 1)
                + b.reshape(1, -1, 1, 1))

    out = jax.nn.relu(bn(conv3(x, params["w1"], stride), params["g1"], params["b1"]))
    out = bn(conv3(out, params["w2"], 1), params["g2"], params["b2"])
    if "wsc" in params:
        sc = lax.conv_general_dilated(x, params["wsc"], (stride, stride), "VALID",
                                      dimension_numbers=("NCHW", "OIHW", "NCHW"))
        sc = bn(sc, params["gsc"], params["bsc"])
    else:
        sc = x
    return jax.nn.relu(out + sc)


if __name__ == "__main__":
    key = jax.random.PRNGKey(0)
    kx, kp = jax.random.split(key)

    in_planes, planes, stride = 4, 8, 2   # exercises the 1x1-conv shortcut
    x = jax.random.normal(kx, (2, in_planes, 16, 16), jnp.float32)  # NCHW like PyTorch
    params = init_basic_block(kp, in_planes, planes, stride)

    fwd = jax.jit(basic_block_forward, static_argnums=(2,))
    out = jax.block_until_ready(fwd(x, params, stride))

    assert out.shape == (2, planes, 16 // stride, 16 // stride), out.shape
    assert bool(jnp.all(out >= 0.0))                               # final ReLU

    # bf16 operands vs f32 reference: tolerance check (typical max err ~1e-2).
    ref = reference_forward(x, params, stride)
    err = float(jnp.max(jnp.abs(out - ref)))
    assert err < 0.3, f"max abs err vs f32 reference: {err}"

    print("KERNEL_OK")
</pallas_src>

<mosaic_0001>
module attributes {stable_mosaic.version = 11 : i64} {
  func.func @_conv_stats_kernel(%arg0: i32, %arg1: memref<128x36xbf16, #tpu.memory_space<vmem>>, %arg2: memref<36x128xbf16, #tpu.memory_space<vmem>>, %arg3: memref<128x128xbf16, #tpu.memory_space<vmem>>, %arg4: memref<8x128xf32, #tpu.memory_space<vmem>>) attributes {dimension_semantics = [#tpu.dimension_semantics<parallel>], iteration_bounds = array<i64: 1>, scalar_prefetch = 0 : i64, scratch_operands = 0 : i64, tpu.core_type = #tpu.core_type<tc>, window_params = [{transform_indices = @transform_0, window_bounds = array<i64: 128, 36>}, {pipeline_mode = #tpu.pipeline_mode<synchronous>, transform_indices = @transform_1, window_bounds = array<i64: 36, 128>}, {transform_indices = @transform_2, window_bounds = array<i64: 128, 128>}, {transform_indices = @transform_3, window_bounds = array<i64: 8, 128>}]} {
    %c0 = arith.constant 0 : index
    %c0_0 = arith.constant 0 : index
    %0 = vector.load %arg1[%c0, %c0_0] : memref<128x36xbf16, #tpu.memory_space<vmem>>, vector<128x36xbf16>
    %c0_1 = arith.constant 0 : index
    %c0_2 = arith.constant 0 : index
    %1 = vector.load %arg2[%c0_1, %c0_2] : memref<36x128xbf16, #tpu.memory_space<vmem>>, vector<36x128xbf16>
    %cst = arith.constant dense<0.000000e+00> : vector<128x128xf32>
    %2 = tpu.matmul %0, %1, %cst {dimension_numbers = #tpu.dot_dimension_numbers<[1], [0], [0], [1], [0, 0, 1, 1], [], []>} : vector<128x36xbf16>, vector<36x128xbf16>, vector<128x128xf32> -> vector<128x128xf32>
    %3 = arith.truncf %2 : vector<128x128xf32> to vector<128x128xbf16>
    %c0_3 = arith.constant 0 : index
    %c0_4 = arith.constant 0 : index
    %4 = vector.load %arg3[%c0_3, %c0_4] : memref<128x128xbf16, #tpu.memory_space<vmem>>, vector<128x128xbf16>
    tpu.vector_store %arg3[%c0_3, %c0_4], %3 {strides = array<i32>} : memref<128x128xbf16, #tpu.memory_space<vmem>>, vector<128x128xbf16>,
    %cst_5 = arith.constant dense<0.000000e+00> : vector<128xf32>
    %5 = vector.multi_reduction <add>, %2, %cst_5 [0] : vector<128x128xf32> to vector<128xf32>
    %6 = vector.shape_cast %5 : vector<128xf32> to vector<1x128xf32>
    %7 = arith.mulf %2, %2 : vector<128x128xf32>
    %cst_6 = arith.constant dense<0.000000e+00> : vector<128xf32>
    %8 = vector.multi_reduction <add>, %7, %cst_6 [0] : vector<128x128xf32> to vector<128xf32>
    %9 = vector.shape_cast %8 : vector<128xf32> to vector<1x128xf32>
    %10 = tpu.iota {dimensions = array<i32: 0>} : vector<8x128xi32>
    %c0_i32 = arith.constant 0 : i32
    %11 = vector.broadcast %c0_i32 : i32 to vector<8x128xi32>
    %12 = arith.cmpi eq, %10, %11 : vector<8x128xi32>
    %cst_7 = arith.constant 0.000000e+00 : f32
    %13 = vector.shape_cast %6 : vector<1x128xf32> to vector<1x128xf32>
    %14 = vector.broadcast %13 : vector<1x128xf32> to vector<8x128xf32>
    %15 = vector.broadcast %cst_7 : f32 to vector<8x128xf32>
    %16 = arith.select %12, %14, %15 : vector<8x128xi1>, vector<8x128xf32>
    %c1_i32 = arith.constant 1 : i32
    %17 = vector.broadcast %c1_i32 : i32 to vector<8x128xi32>
    %18 = arith.cmpi eq, %10, %17 : vector<8x128xi32>
    %cst_8 = arith.constant 0.000000e+00 : f32
    %19 = vector.shape_cast %9 : vector<1x128xf32> to vector<1x128xf32>
    %20 = vector.broadcast %19 : vector<1x128xf32> to vector<8x128xf32>
    %21 = vector.broadcast %cst_8 : f32 to vector<8x128xf32>
    %22 = arith.select %18, %20, %21 : vector<8x128xi1>, vector<8x128xf32>
    %23 = arith.addf %16, %22 : vector<8x128xf32>
    %c0_9 = arith.constant 0 : index
    %c0_10 = arith.constant 0 : index
    %24 = vector.load %arg4[%c0_9, %c0_10] : memref<8x128xf32, #tpu.memory_space<vmem>>, vector<8x128xf32>
    tpu.vector_store %arg4[%c0_9, %c0_10], %23 {strides = array<i32>} : memref<8x128xf32, #tpu.memory_space<vmem>>, vector<8x128xf32>,
    return
  }
  func.func @transform_0(%arg0: i32) -> (i32, i32) {
    %c0_i32 = arith.constant 0 : i32
    %c0_i32_0 = arith.constant 0 : i32
    return %arg0, %c0_i32 : i32, i32
  }
  func.func @transform_1(%arg0: i32) -> (i32, i32) {
    %c0_i32 = arith.constant 0 : i32
    %c0_i32_0 = arith.constant 0 : i32
    %c0_i32_1 = arith.constant 0 : i32
    return %c0_i32, %c0_i32_0 : i32, i32
  }
  func.func @transform_2(%arg0: i32) -> (i32, i32) {
    %c0_i32 = arith.constant 0 : i32
    %c0_i32_0 = arith.constant 0 : i32
    return %arg0, %c0_i32 : i32, i32
  }
  func.func @transform_3(%arg0: i32) -> (i32, i32) {
    %c0_i32 = arith.constant 0 : i32
    %c0_i32_0 = arith.constant 0 : i32
    return %arg0, %c0_i32 : i32, i32
  }
}

module attributes {stable_mosaic.version = 11 : i64} {
  func.func @kernel(%arg0: i32, %arg1: memref<128x128xbf16, #tpu.memory_space<vmem>>, %arg2: memref<1x128xf32, #tpu.memory_space<vmem>>, %arg3: memref<1x128xf32, #tpu.memory_space<vmem>>, %arg4: memref<128x128xbf16, #tpu.memory_space<vmem>>) attributes {dimension_semantics = [#tpu.dimension_semantics<parallel>], iteration_bounds = array<i64: 1>, scalar_prefetch = 0 : i64, scratch_operands = 0 : i64, tpu.core_type = #tpu.core_type<tc>, window_params = [{transform_indices = @transform_0, window_bounds = array<i64: 128, 128>}, {pipeline_mode = #tpu.pipeline_mode<synchronous>, transform_indices = @transform_1, window_bounds = array<i64: 1, 128>}, {pipeline_mode = #tpu.pipeline_mode<synchronous>, transform_indices = @transform_2, window_bounds = array<i64: 1, 128>}, {transform_indices = @transform_3, window_bounds = array<i64: 128, 128>}]} {
    %c0 = arith.constant 0 : index
    %c0_0 = arith.constant 0 : index
    %0 = vector.load %arg1[%c0, %c0_0] : memref<128x128xbf16, #tpu.memory_space<vmem>>, vector<128x128xbf16>
    %1 = arith.extf %0 : vector<128x128xbf16> to vector<128x128xf32>
    %c0_1 = arith.constant 0 : index
    %c0_2 = arith.constant 0 : index
    %2 = vector.load %arg2[%c0_1, %c0_2] : memref<1x128xf32, #tpu.memory_space<vmem>>, vector<1x128xf32>
    %3 = vector.broadcast %2 : vector<1x128xf32> to vector<128x128xf32>
    %4 = arith.mulf %1, %3 : vector<128x128xf32>
    %c0_3 = arith.constant 0 : index
    %c0_4 = arith.constant 0 : index
    %5 = vector.load %arg3[%c0_3, %c0_4] : memref<1x128xf32, #tpu.memory_space<vmem>>, vector<1x128xf32>
    %6 = vector.broadcast %5 : vector<1x128xf32> to vector<128x128xf32>
    %7 = arith.addf %4, %6 : vector<128x128xf32>
    %cst = arith.constant 0.000000e+00 : f32
    %8 = vector.broadcast %cst : f32 to vector<128x128xf32>
    %9 = arith.maximumf %7, %8 : vector<128x128xf32>
    %10 = arith.truncf %9 : vector<128x128xf32> to vector<128x128xbf16>
    %c0_5 = arith.constant 0 : index
    %c0_6 = arith.constant 0 : index
    %11 = vector.load %arg4[%c0_5, %c0_6] : memref<128x128xbf16, #tpu.memory_space<vmem>>, vector<128x128xbf16>
    tpu.vector_store %arg4[%c0_5, %c0_6], %10 {strides = array<i32>} : memref<128x128xbf16, #tpu.memory_space<vmem>>, vector<128x128xbf16>,
    return
  }
  func.func @transform_0(%arg0: i32) -> (i32, i32) {
    %c0_i32 = arith.constant 0 : i32
    %c0_i32_0 = arith.constant 0 : i32
    return %arg0, %c0_i32 : i32, i32
  }
  func.func @transform_1(%arg0: i32) -> (i32, i32) {
    %c0_i32 = arith.constant 0 : i32
    %c0_i32_0 = arith.constant 0 : i32
    %c0_i32_1 = arith.constant 0 : i32
    return %c0_i32, %c0_i32_0 : i32, i32
  }
  func.func @transform_2(%arg0: i32) -> (i32, i32) {
    %c0_i32 = arith.constant 0 : i32
    %c0_i32_0 = arith.constant 0 : i32
    %c0_i32_1 = arith.constant 0 : i32
    return %c0_i32, %c0_i32_0 : i32, i32
  }
  func.func @transform_3(%arg0: i32) -> (i32, i32) {
    %c0_i32 = arith.constant 0 : i32
    %c0_i32_0 = arith.constant 0 : i32
    return %arg0, %c0_i32 : i32, i32
  }
}

module attributes {stable_mosaic.version = 11 : i64} {
  func.func @_conv_stats_kernel(%arg0: i32, %arg1: memref<128x72xbf16, #tpu.memory_space<vmem>>, %arg2: memref<72x128xbf16, #tpu.memory_space<vmem>>, %arg3: memref<128x128xbf16, #tpu.memory_space<vmem>>, %arg4: memref<8x128xf32, #tpu.memory_space<vmem>>) attributes {dimension_semantics = [#tpu.dimension_semantics<parallel>], iteration_bounds = array<i64: 1>, scalar_prefetch = 0 : i64, scratch_operands = 0 : i64, tpu.core_type = #tpu.core_type<tc>, window_params = [{transform_indices = @transform_0, window_bounds = array<i64: 128, 72>}, {pipeline_mode = #tpu.pipeline_mode<synchronous>, transform_indices = @transform_1, window_bounds = array<i64: 72, 128>}, {transform_indices = @transform_2, window_bounds = array<i64: 128, 128>}, {transform_indices = @transform_3, window_bounds = array<i64: 8, 128>}]} {
    %c0 = arith.constant 0 : index
    %c0_0 = arith.constant 0 : index
    %0 = vector.load %arg1[%c0, %c0_0] : memref<128x72xbf16, #tpu.memory_space<vmem>>, vector<128x72xbf16>
    %c0_1 = arith.constant 0 : index
    %c0_2 = arith.constant 0 : index
    %1 = vector.load %arg2[%c0_1, %c0_2] : memref<72x128xbf16, #tpu.memory_space<vmem>>, vector<72x128xbf16>
    %cst = arith.constant dense<0.000000e+00> : vector<128x128xf32>
    %2 = tpu.matmul %0, %1, %cst {dimension_numbers = #tpu.dot_dimension_numbers<[1], [0], [0], [1], [0, 0, 1, 1], [], []>} : vector<128x72xbf16>, vector<72x128xbf16>, vector<128x128xf32> -> vector<128x128xf32>
    %3 = arith.truncf %2 : vector<128x128xf32> to vector<128x128xbf16>
    %c0_3 = arith.constant 0 : index
    %c0_4 = arith.constant 0 : index
    %4 = vector.load %arg3[%c0_3, %c0_4] : memref<128x128xbf16, #tpu.memory_space<vmem>>, vector<128x128xbf16>
    tpu.vector_store %arg3[%c0_3, %c0_4], %3 {strides = array<i32>} : memref<128x128xbf16, #tpu.memory_space<vmem>>, vector<128x128xbf16>,
    %cst_5 = arith.constant dense<0.000000e+00> : vector<128xf32>
    %5 = vector.multi_reduction <add>, %2, %cst_5 [0] : vector<128x128xf32> to vector<128xf32>
    %6 = vector.shape_cast %5 : vector<128xf32> to vector<1x128xf32>
    %7 = arith.mulf %2, %2 : vector<128x128xf32>
    %cst_6 = arith.constant dense<0.000000e+00> : vector<128xf32>
    %8 = vector.multi_reduction <add>, %7, %cst_6 [0] : vector<128x128xf32> to vector<128xf32>
    %9 = vector.shape_cast %8 : vector<128xf32> to vector<1x128xf32>
    %10 = tpu.iota {dimensions = array<i32: 0>} : vector<8x128xi32>
    %c0_i32 = arith.constant 0 : i32
    %11 = vector.broadcast %c0_i32 : i32 to vector<8x128xi32>
    %12 = arith.cmpi eq, %10, %11 : vector<8x128xi32>
    %cst_7 = arith.constant 0.000000e+00 : f32
    %13 = vector.shape_cast %6 : vector<1x128xf32> to vector<1x128xf32>
    %14 = vector.broadcast %13 : vector<1x128xf32> to vector<8x128xf32>
    %15 = vector.broadcast %cst_7 : f32 to vector<8x128xf32>
    %16 = arith.select %12, %14, %15 : vector<8x128xi1>, vector<8x128xf32>
    %c1_i32 = arith.constant 1 : i32
    %17 = vector.broadcast %c1_i32 : i32 to vector<8x128xi32>
    %18 = arith.cmpi eq, %10, %17 : vector<8x128xi32>
    %cst_8 = arith.constant 0.000000e+00 : f32
    %19 = vector.shape_cast %9 : vector<1x128xf32> to vector<1x128xf32>
    %20 = vector.broadcast %19 : vector<1x128xf32> to vector<8x128xf32>
    %21 = vector.broadcast %cst_8 : f32 to vector<8x128xf32>
    %22 = arith.select %18, %20, %21 : vector<8x128xi1>, vector<8x128xf32>
    %23 = arith.addf %16, %22 : vector<8x128xf32>
    %c0_9 = arith.constant 0 : index
    %c0_10 = arith.constant 0 : index
    %24 = vector.load %arg4[%c0_9, %c0_10] : memref<8x128xf32, #tpu.memory_space<vmem>>, vector<8x128xf32>
    tpu.vector_store %arg4[%c0_9, %c0_10], %23 {strides = array<i32>} : memref<8x128xf32, #tpu.memory_space<vmem>>, vector<8x128xf32>,
    return
  }
  func.func @transform_0(%arg0: i32) -> (i32, i32) {
    %c0_i32 = arith.constant 0 : i32
    %c0_i32_0 = arith.constant 0 : i32
    return %arg0, %c0_i32 : i32, i32
  }
  func.func @transform_1(%arg0: i32) -> (i32, i32) {
    %c0_i32 = arith.constant 0 : i32
    %c0_i32_0 = arith.constant 0 : i32
    %c0_i32_1 = arith.constant 0 : i32
    return %c0_i32, %c0_i32_0 : i32, i32
  }
  func.func @transform_2(%arg0: i32) -> (i32, i32) {
    %c0_i32 = arith.constant 0 : i32
    %c0_i32_0 = arith.constant 0 : i32
    return %arg0, %c0_i32 : i32, i32
  }
  func.func @transform_3(%arg0: i32) -> (i32, i32) {
    %c0_i32 = arith.constant 0 : i32
    %c0_i32_0 = arith.constant 0 : i32
    return %arg0, %c0_i32 : i32, i32
  }
}

module attributes {stable_mosaic.version = 11 : i64} {
  func.func @_conv_stats_kernel(%arg0: i32, %arg1: memref<128x4xbf16, #tpu.memory_space<vmem>>, %arg2: memref<4x128xbf16, #tpu.memory_space<vmem>>, %arg3: memref<128x128xbf16, #tpu.memory_space<vmem>>, %arg4: memref<8x128xf32, #tpu.memory_space<vmem>>) attributes {dimension_semantics = [#tpu.dimension_semantics<parallel>], iteration_bounds = array<i64: 1>, scalar_prefetch = 0 : i64, scratch_operands = 0 : i64, tpu.core_type = #tpu.core_type<tc>, window_params = [{transform_indices = @transform_0, window_bounds = array<i64: 128, 4>}, {pipeline_mode = #tpu.pipeline_mode<synchronous>, transform_indices = @transform_1, window_bounds = array<i64: 4, 128>}, {transform_indices = @transform_2, window_bounds = array<i64: 128, 128>}, {transform_indices = @transform_3, window_bounds = array<i64: 8, 128>}]} {
    %c0 = arith.constant 0 : index
    %c0_0 = arith.constant 0 : index
    %0 = vector.load %arg1[%c0, %c0_0] : memref<128x4xbf16, #tpu.memory_space<vmem>>, vector<128x4xbf16>
    %c0_1 = arith.constant 0 : index
    %c0_2 = arith.constant 0 : index
    %1 = vector.load %arg2[%c0_1, %c0_2] : memref<4x128xbf16, #tpu.memory_space<vmem>>, vector<4x128xbf16>
    %cst = arith.constant dense<0.000000e+00> : vector<128x128xf32>
    %2 = tpu.matmul %0, %1, %cst {dimension_numbers = #tpu.dot_dimension_numbers<[1], [0], [0], [1], [0, 0, 1, 1], [], []>} : vector<128x4xbf16>, vector<4x128xbf16>, vector<128x128xf32> -> vector<128x128xf32>
    %3 = arith.truncf %2 : vector<128x128xf32> to vector<128x128xbf16>
    %c0_3 = arith.constant 0 : index
    %c0_4 = arith.constant 0 : index
    %4 = vector.load %arg3[%c0_3, %c0_4] : memref<128x128xbf16, #tpu.memory_space<vmem>>, vector<128x128xbf16>
    tpu.vector_store %arg3[%c0_3, %c0_4], %3 {strides = array<i32>} : memref<128x128xbf16, #tpu.memory_space<vmem>>, vector<128x128xbf16>,
    %cst_5 = arith.constant dense<0.000000e+00> : vector<128xf32>
    %5 = vector.multi_reduction <add>, %2, %cst_5 [0] : vector<128x128xf32> to vector<128xf32>
    %6 = vector.shape_cast %5 : vector<128xf32> to vector<1x128xf32>
    %7 = arith.mulf %2, %2 : vector<128x128xf32>
    %cst_6 = arith.constant dense<0.000000e+00> : vector<128xf32>
    %8 = vector.multi_reduction <add>, %7, %cst_6 [0] : vector<128x128xf32> to vector<128xf32>
    %9 = vector.shape_cast %8 : vector<128xf32> to vector<1x128xf32>
    %10 = tpu.iota {dimensions = array<i32: 0>} : vector<8x128xi32>
    %c0_i32 = arith.constant 0 : i32
    %11 = vector.broadcast %c0_i32 : i32 to vector<8x128xi32>
    %12 = arith.cmpi eq, %10, %11 : vector<8x128xi32>
    %cst_7 = arith.constant 0.000000e+00 : f32
    %13 = vector.shape_cast %6 : vector<1x128xf32> to vector<1x128xf32>
    %14 = vector.broadcast %13 : vector<1x128xf32> to vector<8x128xf32>
    %15 = vector.broadcast %cst_7 : f32 to vector<8x128xf32>
    %16 = arith.select %12, %14, %15 : vector<8x128xi1>, vector<8x128xf32>
    %c1_i32 = arith.constant 1 : i32
    %17 = vector.broadcast %c1_i32 : i32 to vector<8x128xi32>
    %18 = arith.cmpi eq, %10, %17 : vector<8x128xi32>
    %cst_8 = arith.constant 0.000000e+00 : f32
    %19 = vector.shape_cast %9 : vector<1x128xf32> to vector<1x128xf32>
    %20 = vector.broadcast %19 : vector<1x128xf32> to vector<8x128xf32>
    %21 = vector.broadcast %cst_8 : f32 to vector<8x128xf32>
    %22 = arith.select %18, %20, %21 : vector<8x128xi1>, vector<8x128xf32>
    %23 = arith.addf %16, %22 : vector<8x128xf32>
    %c0_9 = arith.constant 0 : index
    %c0_10 = arith.constant 0 : index
    %24 = vector.load %arg4[%c0_9, %c0_10] : memref<8x128xf32, #tpu.memory_space<vmem>>, vector<8x128xf32>
    tpu.vector_store %arg4[%c0_9, %c0_10], %23 {strides = array<i32>} : memref<8x128xf32, #tpu.memory_space<vmem>>, vector<8x128xf32>,
    return
  }
  func.func @transform_0(%arg0: i32) -> (i32, i32) {
    %c0_i32 = arith.constant 0 : i32
    %c0_i32_0 = arith.constant 0 : i32
    return %arg0, %c0_i32 : i32, i32
  }
  func.func @transform_1(%arg0: i32) -> (i32, i32) {
    %c0_i32 = arith.constant 0 : i32
    %c0_i32_0 = arith.constant 0 : i32
    %c0_i32_1 = arith.constant 0 : i32
    return %c0_i32, %c0_i32_0 : i32, i32
  }
  func.func @transform_2(%arg0: i32) -> (i32, i32) {
    %c0_i32 = arith.constant 0 : i32
    %c0_i32_0 = arith.constant 0 : i32
    return %arg0, %c0_i32 : i32, i32
  }
  func.func @transform_3(%arg0: i32) -> (i32, i32) {
    %c0_i32 = arith.constant 0 : i32
    %c0_i32_0 = arith.constant 0 : i32
    return %arg0, %c0_i32 : i32, i32
  }
}

module attributes {stable_mosaic.version = 11 : i64} {
  func.func @kernel(%arg0: i32, %arg1: memref<128x128xbf16, #tpu.memory_space<vmem>>, %arg2: memref<1x128xf32, #tpu.memory_space<vmem>>, %arg3: memref<1x128xf32, #tpu.memory_space<vmem>>, %arg4: memref<128x128xbf16, #tpu.memory_space<vmem>>, %arg5: memref<1x128xf32, #tpu.memory_space<vmem>>, %arg6: memref<1x128xf32, #tpu.memory_space<vmem>>, %arg7: memref<128x128xf32, #tpu.memory_space<vmem>>) attributes {dimension_semantics = [#tpu.dimension_semantics<parallel>], iteration_bounds = array<i64: 1>, scalar_prefetch = 0 : i64, scratch_operands = 0 : i64, tpu.core_type = #tpu.core_type<tc>, window_params = [{transform_indices = @transform_0, window_bounds = array<i64: 128, 128>}, {pipeline_mode = #tpu.pipeline_mode<synchronous>, transform_indices = @transform_1, window_bounds = array<i64: 1, 128>}, {pipeline_mode = #tpu.pipeline_mode<synchronous>, transform_indices = @transform_2, window_bounds = array<i64: 1, 128>}, {transform_indices = @transform_3, window_bounds = array<i64: 128, 128>}, {pipeline_mode = #tpu.pipeline_mode<synchronous>, transform_indices = @transform_4, window_bounds = array<i64: 1, 128>}, {pipeline_mode = #tpu.pipeline_mode<synchronous>, transform_indices = @transform_5, window_bounds = array<i64: 1, 128>}, {transform_indices = @transform_6, window_bounds = array<i64: 128, 128>}]} {
    %c0 = arith.constant 0 : index
    %c0_0 = arith.constant 0 : index
    %0 = vector.load %arg1[%c0, %c0_0] : memref<128x128xbf16, #tpu.memory_space<vmem>>, vector<128x128xbf16>
    %1 = arith.extf %0 : vector<128x128xbf16> to vector<128x128xf32>
    %c0_1 = arith.constant 0 : index
    %c0_2 = arith.constant 0 : index
    %2 = vector.load %arg2[%c0_1, %c0_2] : memref<1x128xf32, #tpu.memory_space<vmem>>, vector<1x128xf32>
    %3 = vector.broadcast %2 : vector<1x128xf32> to vector<128x128xf32>
    %4 = arith.mulf %1, %3 : vector<128x128xf32>
    %c0_3 = arith.constant 0 : index
    %c0_4 = arith.constant 0 : index
    %5 = vector.load %arg3[%c0_3, %c0_4] : memref<1x128xf32, #tpu.memory_space<vmem>>, vector<1x128xf32>
    %6 = vector.broadcast %5 : vector<1x128xf32> to vector<128x128xf32>
    %7 = arith.addf %4, %6 : vector<128x128xf32>
    %c0_5 = arith.constant 0 : index
    %c0_6 = arith.constant 0 : index
    %8 = vector.load %arg4[%c0_5, %c0_6] : memref<128x128xbf16, #tpu.memory_space<vmem>>, vector<128x128xbf16>
    %9 = arith.extf %8 : vector<128x128xbf16> to vector<128x128xf32>
    %c0_7 = arith.constant 0 : index
    %c0_8 = arith.constant 0 : index
    %10 = vector.load %arg5[%c0_7, %c0_8] : memref<1x128xf32, #tpu.memory_space<vmem>>, vector<1x128xf32>
    %11 = vector.broadcast %10 : vector<1x128xf32> to vector<128x128xf32>
    %12 = arith.mulf %9, %11 : vector<128x128xf32>
    %13 = arith.addf %7, %12 : vector<128x128xf32>
    %c0_9 = arith.constant 0 : index
    %c0_10 = arith.constant 0 : index
    %14 = vector.load %arg6[%c0_9, %c0_10] : memref<1x128xf32, #tpu.memory_space<vmem>>, vector<1x128xf32>
    %15 = vector.broadcast %14 : vector<1x128xf32> to vector<128x128xf32>
    %16 = arith.addf %13, %15 : vector<128x128xf32>
    %cst = arith.constant 0.000000e+00 : f32
    %17 = vector.broadcast %cst : f32 to vector<128x128xf32>
    %18 = arith.maximumf %16, %17 : vector<128x128xf32>
    %c0_11 = arith.constant 0 : index
    %c0_12 = arith.constant 0 : index
    %19 = vector.load %arg7[%c0_11, %c0_12] : memref<128x128xf32, #tpu.memory_space<vmem>>, vector<128x128xf32>
    tpu.vector_store %arg7[%c0_11, %c0_12], %18 {strides = array<i32>} : memref<128x128xf32, #tpu.memory_space<vmem>>, vector<128x128xf32>,
    return
  }
  func.func @transform_0(%arg0: i32) -> (i32, i32) {
    %c0_i32 = arith.constant 0 : i32
    %c0_i32_0 = arith.constant 0 : i32
    return %arg0, %c0_i32 : i32, i32
  }
  func.func @transform_1(%arg0: i32) -> (i32, i32) {
    %c0_i32 = arith.constant 0 : i32
    %c0_i32_0 = arith.constant 0 : i32
    %c0_i32_1 = arith.constant 0 : i32
    return %c0_i32, %c0_i32_0 : i32, i32
  }
  func.func @transform_2(%arg0: i32) -> (i32, i32) {
    %c0_i32 = arith.constant 0 : i32
    %c0_i32_0 = arith.constant 0 : i32
    %c0_i32_1 = arith.constant 0 : i32
    return %c0_i32, %c0_i32_0 : i32, i32
  }
  func.func @transform_3(%arg0: i32) -> (i32, i32) {
    %c0_i32 = arith.constant 0 : i32
    %c0_i32_0 = arith.constant 0 : i32
    return %arg0, %c0_i32 : i32, i32
  }
  func.func @transform_4(%arg0: i32) -> (i32, i32) {
    %c0_i32 = arith.constant 0 : i32
    %c0_i32_0 = arith.constant 0 : i32
    %c0_i32_1 = arith.constant 0 : i32
    return %c0_i32, %c0_i32_0 : i32, i32
  }
  func.func @transform_5(%arg0: i32) -> (i32, i32) {
    %c0_i32 = arith.constant 0 : i32
    %c0_i32_0 = arith.constant 0 : i32
    %c0_i32_1 = arith.constant 0 : i32
    return %c0_i32, %c0_i32_0 : i32, i32
  }
  func.func @transform_6(%arg0: i32) -> (i32, i32) {
    %c0_i32 = arith.constant 0 : i32
    %c0_i32_0 = arith.constant 0 : i32
    return %arg0, %c0_i32 : i32, i32
  }
}

</mosaic_0001>

<bundles_post_ra>
// kernel: basic_block_forward.6
= control target key start
LH: loop header
LB: loop body
LE: loop exit
PB: predicated region body
PF: predicated region fallthrough
CT: control target
= control target key end

     0   :  { %s422_s0 = inlined_call_operand.vmem [shape: bf16[128,128], index: 0, kind: input, shape index: {}]   ;;  %s423_s1 = inlined_call_operand.vmem [shape: f32[1,128], index: 1, kind: input, shape index: {}]   ;;  %s424_s2 = inlined_call_operand.vmem [shape: f32[1,128], index: 2, kind: input, shape index: {}]   ;;  %s425_s3 = inlined_call_operand.vmem [shape: bf16[128,128], index: 3, kind: output, shape index: {}]  }
   0x1   :  { %v227_v0 = vld [vmem:[%s422_s0] sm:$0xff]   ;;  %v298_v4 = vld [vmem:[%s422_s0 + $0x8] sm:$0xff]   ;;  %v299_v5 = vld [vmem:[%s422_s0 + $0x10] sm:$0xff]  }
   0x2   :  { %v338_v1 = vld [vmem:[%s423_s1] ss:$0 sm:$0xff]  ;;  %v228_v2 = vunpack.c.l.bf16 %v227_v0  ;;  %v229_v3 = vunpack.c.h.bf16 %v227_v0  ;;  %v300_v6 = vld [vmem:[%s422_s0 + $0x18] sm:$0xff]   ;;  %v232_v8 = vunpack.c.l.bf16 %v298_v4  ;;  %v233_v9 = vunpack.c.h.bf16 %v298_v4  ;;  %v302_v33 = vld [vmem:[%s422_s0 + $0x28] sm:$0xff]  }
   0x3   :  { %v352_v7 = vld [vmem:[%s424_s2] ss:$0 sm:$0xff]  ;;  %v236_v10 = vunpack.c.l.bf16 %v299_v5  ;;  %v237_v11 = vunpack.c.h.bf16 %v299_v5  ;;  %v240_v14 = vunpack.c.l.bf16 %v300_v6  ;;  %v241_v15 = vunpack.c.h.bf16 %v300_v6  ;;  %v303_v38 = vld [vmem:[%s422_s0 + $0x30] sm:$0xff]   ;;  %v304_v43 = vld [vmem:[%s422_s0 + $0x38] sm:$0xff]  }
   0x4   :  { %v53_v12 = vmul.f32 %v228_v2, %v338_v1  ;;  %v54_v13 = vmul.f32 %v229_v3, %v338_v1  ;;  %v55_v16 = vmul.f32 %v232_v8, %v338_v1  ;;  %v56_v17 = vmul.f32 %v233_v9, %v338_v1  ;;  %v301_v28 = vld [vmem:[%s422_s0 + $0x20] sm:$0xff]  }
   0x5   :  { %v57_v18 = vmul.f32 %v236_v10, %v338_v1  ;;  %v58_v19 = vmul.f32 %v237_v11, %v338_v1  ;;  %v59_v22 = vmul.f32 %v240_v14, %v338_v1  ;;  %v60_v23 = vmul.f32 %v241_v15, %v338_v1 }
   0x6   :  { %v76_v20 = vadd.f32 %v352_v7, %v53_v12  ;;  %v77_v21 = vadd.f32 %v352_v7, %v54_v13  ;;  %v78_v24 = vadd.f32 %v352_v7, %v55_v16  ;;  %v79_v25 = vadd.f32 %v352_v7, %v56_v17 }
   0x7   :  { %v80_v26 = vadd.f32 %v352_v7, %v57_v18  ;;  %v81_v27 = vadd.f32 %v352_v7, %v58_v19  ;;  %v82_v31 = vadd.f32 %v352_v7, %v59_v22  ;;  %v83_v32 = vadd.f32 %v352_v7, %v60_v23 }
   0x8   :  { %v92_v29 = vmax.f32 %v76_v20, 0.0  ;;  %v93_v30 = vmax.f32 %v77_v21, 0.0  ;;  %v94_v34 = vmax.f32 %v78_v24, 0.0  ;;  %v95_v35 = vmax.f32 %v79_v25, 0.0 }
   0x9   :  { %v96_v36 = vmax.f32 %v80_v26, 0.0  ;;  %v97_v37 = vmax.f32 %v81_v27, 0.0  ;;  %v98_v40 = vmax.f32 %v82_v31, 0.0  ;;  %v99_v41 = vmax.f32 %v83_v32, 0.0 }
   0xa   :  { %v261_v39 = vpack.c.bf16 %v93_v30, %v92_v29  ;;  %v244_v42 = vunpack.c.l.bf16 %v301_v28  ;;  %v266_v44 = vpack.c.bf16 %v95_v35, %v94_v34  ;;  %v245_v46 = vunpack.c.h.bf16 %v301_v28 }
   0xb   :  { %v271_v45 = vpack.c.bf16 %v97_v37, %v96_v36  ;;  %v248_v47 = vunpack.c.l.bf16 %v302_v33  ;;  %v276_v48 = vpack.c.bf16 %v99_v41, %v98_v40  ;;  %v249_v50 = vunpack.c.h.bf16 %v302_v33 }
   0xc   :  { %262 = vst [vmem:[%s425_s3] sm:$0xff] %v261_v39   ;;  %v61_v49 = vmul.f32 %v244_v42, %v338_v1  ;;  %v252_v51 = vunpack.c.l.bf16 %v303_v38  ;;  %305 = vst [vmem:[%s425_s3 + $0x8] sm:$0xff] %v266_v44   ;;  %v62_v52 = vmul.f32 %v245_v46, %v338_v1  ;;  %v253_v54 = vunpack.c.h.bf16 %v303_v38 }
   0xd   :  { %306 = vst [vmem:[%s425_s3 + $0x10] sm:$0xff] %v271_v45   ;;  %v63_v53 = vmul.f32 %v248_v47, %v338_v1  ;;  %v256_v55 = vunpack.c.l.bf16 %v304_v43  ;;  %307 = vst [vmem:[%s425_s3 + $0x18] sm:$0xff] %v276_v48   ;;  %v64_v57 = vmul.f32 %v249_v50, %v338_v1  ;;  %v257_v59 = vunpack.c.h.bf16 %v304_v43 }
   0xe   :  { %v84_v56 = vadd.f32 %v352_v7, %v61_v49  ;;  %v65_v58 = vmul.f32 %v252_v51, %v338_v1  ;;  %v85_v60 = vadd.f32 %v352_v7, %v62_v52  ;;  %v66_v62 = vmul.f32 %v253_v54, %v338_v1 }
   0xf   :  { %v86_v61 = vadd.f32 %v352_v7, %v63_v53  ;;  %v67_v63 = vmul.f32 %v256_v55, %v338_v1  ;;  %v87_v2 = vadd.f32 %v352_v7, %v64_v57  ;;  %v68_v4 = vmul.f32 %v257_v59, %v338_v1 }
  0x10   :  { %v100_v0 = vmax.f32 %v84_v56, 0.0  ;;  %v88_v3 = vadd.f32 %v352_v7, %v65_v58  ;;  %v101_v5 = vmax.f32 %v85_v60, 0.0  ;;  %v89_v8 = vadd.f32 %v352_v7, %v66_v62 }
  0x11   :  { %v102_v6 = vmax.f32 %v86_v61, 0.0  ;;  %v90_v9 = vadd.f32 %v352_v7, %v67_v63  ;;  %v103_v10 = vmax.f32 %v87_v2, 0.0  ;;  %v91_v12 = vadd.f32 %v352_v7, %v68_v4 }
  0x12   :  { %v104_v11 = vmax.f32 %v88_v3, 0.0  ;;  %v281_v13 = vpack.c.bf16 %v101_v5, %v100_v0  ;;  %v105_v14 = vmax.f32 %v89_v8, 0.0 }
  0x13   :  { %v106_v15 = vmax.f32 %v90_v9, 0.0  ;;  %v286_v16 = vpack.c.bf16 %v103_v10, %v102_v6  ;;  %v107_v17 = vmax.f32 %v91_v12, 0.0 }
  0x14   :  { %308 = vst [vmem:[%s425_s3 + $0x20] sm:$0xff] %v281_v13   ;;  %v291_v1 = vpack.c.bf16 %v105_v14, %v104_v11 }
  0x15   :  { %309 = vst [vmem:[%s425_s3 + $0x28] sm:$0xff] %v286_v16   ;;  %v296_v18 = vpack.c.bf16 %v107_v17, %v106_v15 }
  0x16   :  { %310 = vst [vmem:[%s425_s3 + $0x30] sm:$0xff] %v291_v1  }
  0x17   :  { %311 = vst [vmem:[%s425_s3 + $0x38] sm:$0xff] %v296_v18  }

// kernel: basic_block_forward.5
= control target key start
LH: loop header
LB: loop body
LE: loop exit
PB: predicated region body
PF: predicated region fallthrough
CT: control target
= control target key end

     0   :  { %vm90_vm0 = vcmask 293888   ;;  %vm115_vm1 = vcmask 1041408   ;;  %s608_s1 = inlined_call_operand.vmem [shape: bf16[36,128], index: 1, kind: input, shape index: {}]   ;;  %s609_s0 = inlined_call_operand.vmem [shape: bf16[128,36], index: 0, kind: input, shape index: {}]   ;;  %s610_s2 = inlined_call_operand.vmem [shape: bf16[128,128], index: 2, kind: output, shape index: {0}]   ;;  %s611_s3 = inlined_call_operand.vmem [shape: f32[8,128], index: 3, kind: output, shape index: {1}]  }
   0x1   :  { %v509_v0 = vld [vmem:[%s608_s1] sm:$0xff]   ;;  %v510_v1 = vld [vmem:[%s608_s1 + $0x8] sm:$0xff]   ;;  %v511_v2 = vld [vmem:[%s608_s1 + $0x10] ss:$0 sps:$4 sm:$0x33]  }
   0x2   :  { %479 = vmatprep.subr.bf16.mxu0 %v509_v0  ;;  %v512_v3 = vld [vmem:[%s609_s0] sm:$0xff]   ;;  %501 = vmatprep.subr.bf16.mxu1 %v509_v0  ;;  %v117_v5 = vsel %vm115_vm1, %v511_v2, 0  ;;  %v513_v6 = vld [vmem:[%s609_s0 + $0x8] sm:$0xff]   ;;  %v514_v8 = vld [vmem:[%s609_s0 + $0x10] sm:$0xff]  }
   0x3   :  { %480 = vmatpush3.bf16.msra.mxu0 %v509_v0  ;;  %504 = vmatpush3.bf16.msra.mxu1 %v509_v0  ;;  %v516_v4 = vld [vmem:[%s609_s0 + $0x20] sm:$0xff]   ;;  %v517_v7 = vld [vmem:[%s609_s0 + $0x28] sm:$0xff]   ;;  %v518_v9 = vld [vmem:[%s609_s0 + $0x30] sm:$0xff]  }
   0x4   :  { %481 = vmatprep.subr.bf16.mxu0 %v510_v1  ;;  %485 = vmatprep.mubr.msk.bf16.mxu0 %vm90_vm0, %v512_v3  ;;  %v515_v10 = vld [vmem:[%s609_s0 + $0x18] sm:$0xff]  }
   0x5   :  { %502 = vmatprep.subr.bf16.mxu1 %v510_v1  ;;  %493 = vmatprep.mubr.msk.bf16.mxu1 %vm90_vm0, %v516_v4  ;;  %v519_v11 = vld [vmem:[%s609_s0 + $0x38] sm:$0xff]  }
   0x7   :  { %482 = vmatpush3.bf16.msra.mxu0 %v510_v1  ;;  %505 = vmatpush3.bf16.msra.mxu1 %v510_v1 }
   0x8   :  { %507 = vmatprep.subr.msk.bf16.mxu0 %vm115_vm1, %v511_v2  ;;  %508 = vmatprep.subr.msk.bf16.mxu1 %vm115_vm1, %v511_v2 }
   0xb   :  { %484 = vmatpush3.bf16.msra.mxu0 %v117_v5  ;;  %506 = vmatpush3.bf16.msra.mxu1 %v117_v5 }
   0xe   :  { %486 = vmatmul.mubr.msk.bf16.vlgmr.msra.gmra.mrb[0].mxu0 %vm90_vm0, %v513_v6  ;;  %494 = vmatmul.mubr.msk.bf16.vlgmr.msra.gmra.mrb[0].mxu1 %vm90_vm0, %v517_v7 }
   0xf   :  { %489 = vmatprep.mubr.msk.bf16.mxu0 %vm90_vm0, %v514_v8  ;;  %497 = vmatprep.mubr.msk.bf16.mxu1 %vm90_vm0, %v518_v9 }
  0x16   :  { %490 = vmatmul.mubr.msk.bf16.gmra.mrb[4].mxu0 %vm90_vm0, %v515_v10  ;;  %498 = vmatmul.mubr.msk.bf16.gmra.mrb[4].mxu1 %vm90_vm0, %v519_v11 }
  0xe1   :  { %v487_v12 = vpop.f32.mrb[0].mxu0  ;;  %v495_v13 = vpop.f32.mrb[0].mxu1 }
  0xe2   :  { %v153_v14 = vpop.f32.mrb[1].mxu0  ;;  %v185_v15 = vpop.f32.mrb[1].mxu1  ;;  %v319_v27 = vmul.f32 %v487_v12, %v487_v12  ;;  %v327_v63 = vmul.f32 %v495_v13, %v495_v13 }
  0xe3   :  { %v488_v16 = vpop.f32.mrb[2].mxu0  ;;  %v496_v17 = vpop.f32.mrb[2].mxu1  ;;  %v317_v18 = vmul.f32 %v153_v14, %v153_v14  ;;  %v325_v57 = vmul.f32 %v185_v15, %v185_v15 }
  0xe4   :  { %v429_v19 = vpack.c.bf16 %v488_v16, %v487_v12  ;;  %v156_v20 = vpop.f32.mrb[3].mxu0  ;;  %v449_v21 = vpack.c.bf16 %v496_v17, %v495_v13  ;;  %v188_v22 = vpop.f32.mrb[3].mxu1  ;;  %v320_v30 = vmul.f32 %v488_v16, %v488_v16  ;;  %v328_v2 = vmul.f32 %v496_v17, %v496_v17 }
  0xe5   :  { %v424_v23 = vpack.c.bf16 %v156_v20, %v153_v14  ;;  %v296_v24 = vadd.f32 %v156_v20, %v153_v14  ;;  %v318_v25 = vmul.f32 %v156_v20, %v156_v20  ;;  %v444_v26 = vpack.c.bf16 %v188_v22, %v185_v15 }
  0xe6   :  { %461 = vst [vmem:[%s610_s2 + $0x8] sm:$0xff] %v429_v19   ;;  %465 = vst [vmem:[%s610_s2 + $0x28] sm:$0xff] %v449_v21   ;;  %v326_v62 = vmul.f32 %v188_v22, %v188_v22 }
  0xe7   :  { %425 = vst [vmem:[%s610_s2] sm:$0xff] %v424_v23   ;;  %v297_v28 = vadd.f32 %v487_v12, %v296_v24  ;;  %v333_v29 = vadd.f32 %v318_v25, %v317_v18  ;;  %464 = vst [vmem:[%s610_s2 + $0x20] sm:$0xff] %v444_v26  }
  0xe9   :  { %v334_v31 = vadd.f32 %v333_v29, %v319_v27  ;;  %v491_v32 = vpop.f32.mrb[4].mxu0  ;;  %v298_v33 = vadd.f32 %v488_v16, %v297_v28  ;;  %v499_v34 = vpop.f32.mrb[4].mxu1 }
  0xea   :  { %v169_v35 = vpop.f32.mrb[5].mxu0  ;;  %v201_v36 = vpop.f32.mrb[5].mxu1  ;;  %v323_v51 = vmul.f32 %v491_v32, %v491_v32  ;;  %v331_v11 = vmul.f32 %v499_v34, %v499_v34 }
  0xeb   :  { %v299_v37 = vadd.f32 %v298_v33, %v169_v35  ;;  %v321_v38 = vmul.f32 %v169_v35, %v169_v35  ;;  %v335_v39 = vadd.f32 %v334_v31, %v320_v30  ;;  %v492_v40 = vpop.f32.mrb[6].mxu0  ;;  %v500_v41 = vpop.f32.mrb[6].mxu1  ;;  %v329_v5 = vmul.f32 %v201_v36, %v201_v36 }
  0xec   :  { %v439_v42 = vpack.c.bf16 %v492_v40, %v491_v32  ;;  %v172_v43 = vpop.f32.mrb[7].mxu0  ;;  %v459_v44 = vpack.c.bf16 %v500_v41, %v499_v34  ;;  %v204_v45 = vpop.f32.mrb[7].mxu1  ;;  %v324_v54 = vmul.f32 %v492_v40, %v492_v40 }
  0xed   :  { %v336_v46 = vadd.f32 %v335_v39, %v321_v38  ;;  %v434_v47 = vpack.c.bf16 %v172_v43, %v169_v35  ;;  %v300_v48 = vadd.f32 %v299_v37, %v172_v43  ;;  %v322_v49 = vmul.f32 %v172_v43, %v172_v43 }
  0xee   :  { %463 = vst [vmem:[%s610_s2 + $0x18] sm:$0xff] %v439_v42   ;;  %467 = vst [vmem:[%s610_s2 + $0x38] sm:$0xff] %v459_v44   ;;  %v454_v50 = vpack.c.bf16 %v204_v45, %v201_v36  ;;  %v330_v10 = vmul.f32 %v204_v45, %v204_v45 }
  0xef   :  { %462 = vst [vmem:[%s610_s2 + $0x10] sm:$0xff] %v434_v47   ;;  %v301_v52 = vadd.f32 %v491_v32, %v300_v48  ;;  %v337_v53 = vadd.f32 %v336_v46, %v322_v49 }
  0xf0   :  { %466 = vst [vmem:[%s610_s2 + $0x30] sm:$0xff] %v454_v50  }
  0xf1   :  { %v338_v55 = vadd.f32 %v337_v53, %v323_v51  ;;  %v302_v56 = vadd.f32 %v492_v40, %v301_v52 }
  0xf3   :  { %v303_v58 = vadd.f32 %v302_v56, %v185_v15  ;;  %v339_v59 = vadd.f32 %v338_v55, %v324_v54  ;;  %v332_v15 = vmul.f32 %v500_v41, %v500_v41 }
  0xf5   :  { %v340_v60 = vadd.f32 %v339_v59, %v325_v57  ;;  %v304_v61 = vadd.f32 %v303_v58, %v188_v22  ;;  %v354_v22 = vlaneseq }
  0xf7   :  { %v305_v0 = vadd.f32 %v495_v13, %v304_v61  ;;  %v341_v1 = vadd.f32 %v340_v60, %v326_v62  ;;  %v355_v26 = vshrl.u32 %v354_v22, 7 }
  0xf9   :  { %v342_v3 = vadd.f32 %v341_v1, %v327_v63  ;;  %v306_v4 = vadd.f32 %v496_v17, %v305_v0  ;;  %vm356_vm2 = vcmp.eq.s32.totalorder %v355_v26, 0  ;;  %vm358_vm3 = vcmp.eq.s32.totalorder %v355_v26, 1 }
  0xfb   :  { %v307_v6 = vadd.f32 %v306_v4, %v201_v36  ;;  %v343_v7 = vadd.f32 %v342_v3, %v328_v2 }
  0xfd   :  { %v344_v8 = vadd.f32 %v343_v7, %v329_v5  ;;  %v308_v9 = vadd.f32 %v307_v6, %v204_v45 }
  0xff   :  { %v309_v12 = vadd.f32 %v499_v34, %v308_v9  ;;  %v345_v14 = vadd.f32 %v344_v8, %v330_v10 }
 0x101   :  { %v310_v16 = vadd.f32 %v500_v41, %v309_v12  ;;  %v346_v18 = vadd.f32 %v345_v14, %v331_v11 }
 0x103   :  { %v311_v19 = vrot.slane %v310_v16, 4  ;;  %v347_v20 = vadd.f32 %v346_v18, %v332_v15 }
 0x105   :  { %v312_v21 = vadd.f32 %v311_v19, %v310_v16  ;;  %v348_v13 = vrot.slane %v347_v20, 4 }
 0x107   :  { %v313_v23 = vrot.slane %v312_v21, 2  ;;  %v349_v24 = vadd.f32 %v348_v13, %v347_v20 }
 0x109   :  { %v314_v17 = vadd.f32 %v313_v23, %v312_v21  ;;  %v350_v25 = vrot.slane %v349_v24, 2 }
 0x10b   :  { %v315_v27 = vrot.slane %v314_v17, 1  ;;  %v351_v28 = vadd.f32 %v350_v25, %v349_v24 }
 0x10d   :  { %v316_v29 = vadd.f32 %v315_v27, %v314_v17  ;;  %v352_v30 = vrot.slane %v351_v28, 1 }
 0x10f   :  { %v353_v31 = vadd.f32 %v352_v30, %v351_v28  ;;  %v357_v32 = vsel %vm356_vm2, %v316_v29, 0.0 }
 0x111   :  { %v359_v33 = vsel %vm358_vm3, %v353_v31, 0.0 }
 0x112   :  { %v360_v34 = vadd.f32 %v359_v33, %v357_v32 }
 0x114   :  { %361 = vst [vmem:[%s611_s3] sm:$0xff] %v360_v34 }

// kernel: basic_block_forward.8
= control target key start
LH: loop header
LB: loop body
LE: loop exit
PB: predicated region body
PF: predicated region fallthrough
CT: control target
= control target key end

     0   :  { %vm106_vm0 = vcmask 588800   ;;  %vm131_vm1 = vcmask 1043456   ;;  %s644_s1 = inlined_call_operand.vmem [shape: bf16[72,128], index: 1, kind: input, shape index: {}]   ;;  %s645_s0 = inlined_call_operand.vmem [shape: bf16[128,72], index: 0, kind: input, shape index: {}]   ;;  %s646_s2 = inlined_call_operand.vmem [shape: bf16[128,128], index: 2, kind: output, shape index: {0}]   ;;  %s647_s3 = inlined_call_operand.vmem [shape: f32[8,128], index: 3, kind: output, shape index: {1}]  }
   0x1   :  { %v537_v0 = vld [vmem:[%s644_s1] sm:$0xff]   ;;  %v538_v1 = vld [vmem:[%s644_s1 + $0x8] sm:$0xff]   ;;  %v539_v2 = vld [vmem:[%s644_s1 + $0x10] sm:$0xff]  }
   0x2   :  { %499 = vmatprep.subr.bf16.mxu0 %v537_v0  ;;  %525 = vmatprep.subr.bf16.mxu1 %v537_v0  ;;  %v542_v3 = vld [vmem:[%s645_s0] sm:$0xff]   ;;  %v540_v4 = vld [vmem:[%s644_s1 + $0x18] sm:$0xff]   ;;  %v543_v8 = vld [vmem:[%s645_s0 + $0x8] sm:$0xff]  }
   0x3   :  { %500 = vmatpush3.bf16.msra.mxu0 %v537_v0  ;;  %530 = vmatpush3.bf16.msra.mxu1 %v537_v0  ;;  %v546_v5 = vld [vmem:[%s645_s0 + $0x20] sm:$0xff]   ;;  %v547_v9 = vld [vmem:[%s645_s0 + $0x28] sm:$0xff]   ;;  %v544_v10 = vld [vmem:[%s645_s0 + $0x10] sm:$0xff]  }
   0x4   :  { %501 = vmatprep.subr.bf16.mxu0 %v538_v1  ;;  %526 = vmatprep.subr.bf16.mxu1 %v538_v1  ;;  %v541_v6 = vld [vmem:[%s644_s1 + $0x20] ss:$0 sps:$4 sm:$0xff]   ;;  %v548_v11 = vld [vmem:[%s645_s0 + $0x30] sm:$0xff]   ;;  %v545_v12 = vld [vmem:[%s645_s0 + $0x18] sm:$0xff]  }
   0x5   :  { %509 = vmatprep.mubr.msk.bf16.mxu0 %vm106_vm0, %v542_v3  ;;  %517 = vmatprep.mubr.msk.bf16.mxu1 %vm106_vm0, %v546_v5  ;;  %v133_v7 = vsel %vm131_vm1, %v541_v6, 0  ;;  %v549_v13 = vld [vmem:[%s645_s0 + $0x38] sm:$0xff]  }
   0x7   :  { %502 = vmatpush3.bf16.msra.mxu0 %v538_v1  ;;  %531 = vmatpush3.bf16.msra.mxu1 %v538_v1 }
   0x8   :  { %503 = vmatprep.subr.bf16.mxu0 %v539_v2  ;;  %527 = vmatprep.subr.bf16.mxu1 %v539_v2 }
   0xb   :  { %504 = vmatpush3.bf16.msra.mxu0 %v539_v2  ;;  %532 = vmatpush3.bf16.msra.mxu1 %v539_v2 }
   0xc   :  { %505 = vmatprep.subr.bf16.mxu0 %v540_v4  ;;  %528 = vmatprep.subr.bf16.mxu1 %v540_v4 }
   0xf   :  { %506 = vmatpush3.bf16.msra.mxu0 %v540_v4  ;;  %533 = vmatpush3.bf16.msra.mxu1 %v540_v4 }
  0x10   :  { %535 = vmatprep.subr.msk.bf16.mxu0 %vm131_vm1, %v541_v6  ;;  %536 = vmatprep.subr.msk.bf16.mxu1 %vm131_vm1, %v541_v6 }
  0x13   :  { %508 = vmatpush3.bf16.msra.mxu0 %v133_v7  ;;  %534 = vmatpush3.bf16.msra.mxu1 %v133_v7 }
  0x16   :  { %510 = vmatmul.mubr.msk.bf16.vlgmr.msra.gmra.mrb[0].mxu0 %vm106_vm0, %v543_v8  ;;  %518 = vmatmul.mubr.msk.bf16.vlgmr.msra.gmra.mrb[0].mxu1 %vm106_vm0, %v547_v9 }
  0x17   :  { %513 = vmatprep.mubr.msk.bf16.mxu0 %vm106_vm0, %v544_v10  ;;  %521 = vmatprep.mubr.msk.bf16.mxu1 %vm106_vm0, %v548_v11 }
  0x1e   :  { %514 = vmatmul.mubr.msk.bf16.gmra.mrb[4].mxu0 %vm106_vm0, %v545_v12  ;;  %522 = vmatmul.mubr.msk.bf16.gmra.mrb[4].mxu1 %vm106_vm0, %v549_v13 }
  0xe9   :  { %v511_v14 = vpop.f32.mrb[0].mxu0  ;;  %v519_v15 = vpop.f32.mrb[0].mxu1 }
  0xea   :  { %v169_v16 = vpop.f32.mrb[1].mxu0  ;;  %v201_v17 = vpop.f32.mrb[1].mxu1  ;;  %v335_v29 = vmul.f32 %v511_v14, %v511_v14  ;;  %v343_v1 = vmul.f32 %v519_v15, %v519_v15 }
  0xeb   :  { %v512_v18 = vpop.f32.mrb[2].mxu0  ;;  %v520_v19 = vpop.f32.mrb[2].mxu1  ;;  %v333_v20 = vmul.f32 %v169_v16, %v169_v16  ;;  %v341_v59 = vmul.f32 %v201_v17, %v201_v17 }
  0xec   :  { %v447_v21 = vpack.c.bf16 %v512_v18, %v511_v14  ;;  %v172_v22 = vpop.f32.mrb[3].mxu0  ;;  %v467_v23 = vpack.c.bf16 %v520_v19, %v519_v15  ;;  %v204_v24 = vpop.f32.mrb[3].mxu1  ;;  %v336_v32 = vmul.f32 %v512_v18, %v512_v18  ;;  %v344_v4 = vmul.f32 %v520_v19, %v520_v19 }
  0xed   :  { %v442_v25 = vpack.c.bf16 %v172_v22, %v169_v16  ;;  %v312_v26 = vadd.f32 %v172_v22, %v169_v16  ;;  %v334_v27 = vmul.f32 %v172_v22, %v172_v22  ;;  %v462_v28 = vpack.c.bf16 %v204_v24, %v201_v17 }
  0xee   :  { %479 = vst [vmem:[%s646_s2 + $0x8] sm:$0xff] %v447_v21   ;;  %483 = vst [vmem:[%s646_s2 + $0x28] sm:$0xff] %v467_v23   ;;  %v342_v0 = vmul.f32 %v204_v24, %v204_v24 }
  0xef   :  { %443 = vst [vmem:[%s646_s2] sm:$0xff] %v442_v25   ;;  %v313_v30 = vadd.f32 %v511_v14, %v312_v26  ;;  %v349_v31 = vadd.f32 %v334_v27, %v333_v20  ;;  %482 = vst [vmem:[%s646_s2 + $0x20] sm:$0xff] %v462_v28  }
  0xf1   :  { %v350_v33 = vadd.f32 %v349_v31, %v335_v29  ;;  %v515_v34 = vpop.f32.mrb[4].mxu0  ;;  %v314_v35 = vadd.f32 %v512_v18, %v313_v30  ;;  %v523_v36 = vpop.f32.mrb[4].mxu1 }
  0xf2   :  { %v185_v37 = vpop.f32.mrb[5].mxu0  ;;  %v217_v38 = vpop.f32.mrb[5].mxu1  ;;  %v339_v53 = vmul.f32 %v515_v34, %v515_v34  ;;  %v347_v13 = vmul.f32 %v523_v36, %v523_v36 }
  0xf3   :  { %v315_v39 = vadd.f32 %v314_v35, %v185_v37  ;;  %v337_v40 = vmul.f32 %v185_v37, %v185_v37  ;;  %v351_v41 = vadd.f32 %v350_v33, %v336_v32  ;;  %v516_v42 = vpop.f32.mrb[6].mxu0  ;;  %v524_v43 = vpop.f32.mrb[6].mxu1  ;;  %v345_v7 = vmul.f32 %v217_v38, %v217_v38 }
  0xf4   :  { %v457_v44 = vpack.c.bf16 %v516_v42, %v515_v34  ;;  %v188_v45 = vpop.f32.mrb[7].mxu0  ;;  %v477_v46 = vpack.c.bf16 %v524_v43, %v523_v36  ;;  %v220_v47 = vpop.f32.mrb[7].mxu1  ;;  %v340_v56 = vmul.f32 %v516_v42, %v516_v42 }
  0xf5   :  { %v352_v48 = vadd.f32 %v351_v41, %v337_v40  ;;  %v452_v49 = vpack.c.bf16 %v188_v45, %v185_v37  ;;  %v316_v50 = vadd.f32 %v315_v39, %v188_v45  ;;  %v338_v51 = vmul.f32 %v188_v45, %v188_v45 }
  0xf6   :  { %481 = vst [vmem:[%s646_s2 + $0x18] sm:$0xff] %v457_v44   ;;  %485 = vst [vmem:[%s646_s2 + $0x38] sm:$0xff] %v477_v46   ;;  %v472_v52 = vpack.c.bf16 %v220_v47, %v217_v38  ;;  %v346_v12 = vmul.f32 %v220_v47, %v220_v47 }
  0xf7   :  { %480 = vst [vmem:[%s646_s2 + $0x10] sm:$0xff] %v452_v49   ;;  %v317_v54 = vadd.f32 %v515_v34, %v316_v50  ;;  %v353_v55 = vadd.f32 %v352_v48, %v338_v51 }
  0xf8   :  { %484 = vst [vmem:[%s646_s2 + $0x30] sm:$0xff] %v472_v52  }
  0xf9   :  { %v354_v57 = vadd.f32 %v353_v55, %v339_v53  ;;  %v318_v58 = vadd.f32 %v516_v42, %v317_v54 }
  0xfb   :  { %v319_v60 = vadd.f32 %v318_v58, %v201_v17  ;;  %v355_v61 = vadd.f32 %v354_v57, %v340_v56  ;;  %v348_v17 = vmul.f32 %v524_v43, %v524_v43 }
  0xfd   :  { %v356_v62 = vadd.f32 %v355_v61, %v341_v59  ;;  %v320_v63 = vadd.f32 %v319_v60, %v204_v24  ;;  %v370_v24 = vlaneseq }
  0xff   :  { %v321_v2 = vadd.f32 %v519_v15, %v320_v63  ;;  %v357_v3 = vadd.f32 %v356_v62, %v342_v0  ;;  %v371_v28 = vshrl.u32 %v370_v24, 7 }
 0x101   :  { %v358_v5 = vadd.f32 %v357_v3, %v343_v1  ;;  %v322_v6 = vadd.f32 %v520_v19, %v321_v2  ;;  %vm372_vm2 = vcmp.eq.s32.totalorder %v371_v28, 0  ;;  %vm374_vm3 = vcmp.eq.s32.totalorder %v371_v28, 1 }
 0x103   :  { %v323_v8 = vadd.f32 %v322_v6, %v217_v38  ;;  %v359_v9 = vadd.f32 %v358_v5, %v344_v4 }
 0x105   :  { %v360_v10 = vadd.f32 %v359_v9, %v345_v7  ;;  %v324_v11 = vadd.f32 %v323_v8, %v220_v47 }
 0x107   :  { %v325_v14 = vadd.f32 %v523_v36, %v324_v11  ;;  %v361_v16 = vadd.f32 %v360_v10, %v346_v12 }
 0x109   :  { %v326_v18 = vadd.f32 %v524_v43, %v325_v14  ;;  %v362_v20 = vadd.f32 %v361_v16, %v347_v13 }
 0x10b   :  { %v327_v21 = vrot.slane %v326_v18, 4  ;;  %v363_v22 = vadd.f32 %v362_v20, %v348_v17 }
 0x10d   :  { %v328_v23 = vadd.f32 %v327_v21, %v326_v18  ;;  %v364_v15 = vrot.slane %v363_v22, 4 }
 0x10f   :  { %v329_v25 = vrot.slane %v328_v23, 2  ;;  %v365_v26 = vadd.f32 %v364_v15, %v363_v22 }
 0x111   :  { %v330_v19 = vadd.f32 %v329_v25, %v328_v23  ;;  %v366_v27 = vrot.slane %v365_v26, 2 }
 0x113   :  { %v331_v29 = vrot.slane %v330_v19, 1  ;;  %v367_v30 = vadd.f32 %v366_v27, %v365_v26 }
 0x115   :  { %v332_v31 = vadd.f32 %v331_v29, %v330_v19  ;;  %v368_v32 = vrot.slane %v367_v30, 1 }
 0x117   :  { %v369_v33 = vadd.f32 %v368_v32, %v367_v30  ;;  %v373_v34 = vsel %vm372_vm2, %v332_v31, 0.0 }
 0x119   :  { %v375_v35 = vsel %vm374_vm3, %v369_v33, 0.0 }
 0x11a   :  { %v376_v36 = vadd.f32 %v375_v35, %v373_v34 }
 0x11c   :  { %377 = vst [vmem:[%s647_s3] sm:$0xff] %v376_v36 }

// kernel: basic_block_forward.7
= control target key start
LH: loop header
LB: loop body
LE: loop exit
PB: predicated region body
PF: predicated region fallthrough
CT: control target
= control target key end

     0   :  { %vm96_vm0 = vcmask 1041408   ;;  %vm71_vm1 = vcmask 31744   ;;  %s567_s1 = inlined_call_operand.vmem [shape: bf16[4,128], index: 1, kind: input, shape index: {}]   ;;  %s568_s0 = inlined_call_operand.vmem [shape: bf16[128,4], index: 0, kind: input, shape index: {}]   ;;  %s569_s2 = inlined_call_operand.vmem [shape: bf16[128,128], index: 2, kind: output, shape index: {0}]   ;;  %s570_s3 = inlined_call_operand.vmem [shape: f32[8,128], index: 3, kind: output, shape index: {1}]  }
   0x1   :  { %v30_v0 = vld [vmem:[%s567_s1] sm:$0x3]  ;;  %v478_v3 = vld [vmem:[%s568_s0 + $0x8] sm:$0xff]   ;;  %v479_v4 = vld [vmem:[%s568_s0 + $0x10] sm:$0xff]  }
   0x2   :  { %475 = vmatprep.subr.msk.bf16.mxu0 %vm96_vm0, %v30_v0  ;;  %v98_v1 = vsel %vm96_vm0, %v30_v0, 0  ;;  %v477_v2 = vld [vmem:[%s568_s0] sm:$0xff]   ;;  %476 = vmatprep.subr.msk.bf16.mxu1 %vm96_vm0, %v30_v0  ;;  %v482_v6 = vld [vmem:[%s568_s0 + $0x28] sm:$0xff]   ;;  %v483_v7 = vld [vmem:[%s568_s0 + $0x30] sm:$0xff]  }
   0x3   :  { %456 = vmatpush3.bf16.msra.mxu0 %v98_v1  ;;  %474 = vmatpush3.bf16.msra.mxu1 %v98_v1  ;;  %v481_v5 = vld [vmem:[%s568_s0 + $0x20] sm:$0xff]   ;;  %v480_v8 = vld [vmem:[%s568_s0 + $0x18] sm:$0xff]  }
   0x4   :  { %457 = vmatprep.mubr.msk.bf16.mxu0 %vm71_vm1, %v477_v2  ;;  %465 = vmatprep.mubr.msk.bf16.mxu1 %vm71_vm1, %v481_v5  ;;  %v484_v9 = vld [vmem:[%s568_s0 + $0x38] sm:$0xff]  }
   0x6   :  { %458 = vmatmul.mubr.msk.bf16.vlgmr.msra.gmra.mrb[0].mxu0 %vm71_vm1, %v478_v3  ;;  %466 = vmatmul.mubr.msk.bf16.vlgmr.msra.gmra.mrb[0].mxu1 %vm71_vm1, %v482_v6 }
   0x7   :  { %461 = vmatprep.mubr.msk.bf16.mxu0 %vm71_vm1, %v479_v4  ;;  %469 = vmatprep.mubr.msk.bf16.mxu1 %vm71_vm1, %v483_v7 }
   0xe   :  { %462 = vmatmul.mubr.msk.bf16.gmra.mrb[4].mxu0 %vm71_vm1, %v480_v8  ;;  %470 = vmatmul.mubr.msk.bf16.gmra.mrb[4].mxu1 %vm71_vm1, %v484_v9 }
  0xd9   :  { %v459_v10 = vpop.f32.mrb[0].mxu0  ;;  %v467_v15 = vpop.f32.mrb[0].mxu1 }
  0xda   :  { %v134_v11 = vpop.f32.mrb[1].mxu0  ;;  %v166_v20 = vpop.f32.mrb[1].mxu1  ;;  %v300_v22 = vmul.f32 %v459_v10, %v459_v10  ;;  %v308_v61 = vmul.f32 %v467_v15, %v467_v15 }
  0xdb   :  { %v460_v12 = vpop.f32.mrb[2].mxu0  ;;  %v298_v16 = vmul.f32 %v134_v11, %v134_v11  ;;  %v468_v21 = vpop.f32.mrb[2].mxu1  ;;  %v306_v55 = vmul.f32 %v166_v20, %v166_v20 }
  0xdc   :  { %v407_v13 = vpack.c.bf16 %v460_v12, %v459_v10  ;;  %v137_v14 = vpop.f32.mrb[3].mxu0  ;;  %v427_v25 = vpack.c.bf16 %v468_v21, %v467_v15  ;;  %v169_v26 = vpop.f32.mrb[3].mxu1  ;;  %v301_v28 = vmul.f32 %v460_v12, %v460_v12  ;;  %v309_v0 = vmul.f32 %v468_v21, %v468_v21 }
  0xdd   :  { %v402_v17 = vpack.c.bf16 %v137_v14, %v134_v11  ;;  %v277_v18 = vadd.f32 %v137_v14, %v134_v11  ;;  %v299_v19 = vmul.f32 %v137_v14, %v137_v14  ;;  %v422_v27 = vpack.c.bf16 %v169_v26, %v166_v20 }
  0xde   :  { %439 = vst [vmem:[%s569_s2 + $0x8] sm:$0xff] %v407_v13   ;;  %443 = vst [vmem:[%s569_s2 + $0x28] sm:$0xff] %v427_v25   ;;  %v307_v60 = vmul.f32 %v169_v26, %v169_v26 }
  0xdf   :  { %403 = vst [vmem:[%s569_s2] sm:$0xff] %v402_v17   ;;  %v278_v23 = vadd.f32 %v459_v10, %v277_v18  ;;  %v314_v24 = vadd.f32 %v299_v19, %v298_v16  ;;  %442 = vst [vmem:[%s569_s2 + $0x20] sm:$0xff] %v422_v27   ;;  %v335_v19 = vlaneseq }
  0xe1   :  { %v315_v29 = vadd.f32 %v314_v24, %v300_v22  ;;  %v463_v30 = vpop.f32.mrb[4].mxu0  ;;  %v279_v31 = vadd.f32 %v460_v12, %v278_v23  ;;  %v471_v39 = vpop.f32.mrb[4].mxu1  ;;  %v336_v24 = vshrl.u32 %v335_v19, 7 }
  0xe2   :  { %v150_v32 = vpop.f32.mrb[5].mxu0  ;;  %v182_v44 = vpop.f32.mrb[5].mxu1  ;;  %v304_v46 = vmul.f32 %v463_v30, %v463_v30  ;;  %v312_v9 = vmul.f32 %v471_v39, %v471_v39 }
  0xe3   :  { %v280_v33 = vadd.f32 %v279_v31, %v150_v32  ;;  %v302_v34 = vmul.f32 %v150_v32, %v150_v32  ;;  %v316_v35 = vadd.f32 %v315_v29, %v301_v28  ;;  %v464_v36 = vpop.f32.mrb[6].mxu0  ;;  %v472_v45 = vpop.f32.mrb[6].mxu1  ;;  %v310_v3 = vmul.f32 %v182_v44, %v182_v44 }
  0xe4   :  { %v417_v37 = vpack.c.bf16 %v464_v36, %v463_v30  ;;  %v153_v38 = vpop.f32.mrb[7].mxu0  ;;  %v437_v49 = vpack.c.bf16 %v472_v45, %v471_v39  ;;  %v185_v50 = vpop.f32.mrb[7].mxu1  ;;  %v305_v52 = vmul.f32 %v464_v36, %v464_v36  ;;  %v313_v12 = vmul.f32 %v472_v45, %v472_v45 }
  0xe5   :  { %v317_v40 = vadd.f32 %v316_v35, %v302_v34  ;;  %v412_v41 = vpack.c.bf16 %v153_v38, %v150_v32  ;;  %v281_v42 = vadd.f32 %v280_v33, %v153_v38  ;;  %v303_v43 = vmul.f32 %v153_v38, %v153_v38 }
  0xe6   :  { %441 = vst [vmem:[%s569_s2 + $0x18] sm:$0xff] %v417_v37   ;;  %v432_v51 = vpack.c.bf16 %v185_v50, %v182_v44  ;;  %445 = vst [vmem:[%s569_s2 + $0x38] sm:$0xff] %v437_v49   ;;  %v311_v8 = vmul.f32 %v185_v50, %v185_v50  ;;  %vm337_vm2 = vcmp.eq.s32.totalorder %v336_v24, 0  ;;  %vm339_vm3 = vcmp.eq.s32.totalorder %v336_v24, 1 }
  0xe7   :  { %440 = vst [vmem:[%s569_s2 + $0x10] sm:$0xff] %v412_v41   ;;  %v282_v47 = vadd.f32 %v463_v30, %v281_v42  ;;  %v318_v48 = vadd.f32 %v317_v40, %v303_v43 }
  0xe8   :  { %444 = vst [vmem:[%s569_s2 + $0x30] sm:$0xff] %v432_v51  }
  0xe9   :  { %v319_v53 = vadd.f32 %v318_v48, %v304_v46  ;;  %v283_v54 = vadd.f32 %v464_v36, %v282_v47 }
  0xeb   :  { %v284_v56 = vadd.f32 %v283_v54, %v166_v20  ;;  %v320_v57 = vadd.f32 %v319_v53, %v305_v52 }
  0xed   :  { %v321_v58 = vadd.f32 %v320_v57, %v306_v55  ;;  %v285_v59 = vadd.f32 %v284_v56, %v169_v26 }
  0xef   :  { %v286_v62 = vadd.f32 %v467_v15, %v285_v59  ;;  %v322_v63 = vadd.f32 %v321_v58, %v307_v60 }
  0xf1   :  { %v323_v1 = vadd.f32 %v322_v63, %v308_v61  ;;  %v287_v2 = vadd.f32 %v468_v21, %v286_v62 }
  0xf3   :  { %v288_v4 = vadd.f32 %v287_v2, %v182_v44  ;;  %v324_v5 = vadd.f32 %v323_v1, %v309_v0 }
  0xf5   :  { %v325_v6 = vadd.f32 %v324_v5, %v310_v3  ;;  %v289_v7 = vadd.f32 %v288_v4, %v185_v50 }
  0xf7   :  { %v290_v10 = vadd.f32 %v471_v39, %v289_v7  ;;  %v326_v11 = vadd.f32 %v325_v6, %v311_v8 }
  0xf9   :  { %v291_v13 = vadd.f32 %v472_v45, %v290_v10  ;;  %v327_v14 = vadd.f32 %v326_v11, %v312_v9 }
  0xfb   :  { %v292_v16 = vrot.slane %v291_v13, 4  ;;  %v328_v17 = vadd.f32 %v327_v14, %v313_v12 }
  0xfd   :  { %v293_v18 = vadd.f32 %v292_v16, %v291_v13  ;;  %v329_v15 = vrot.slane %v328_v17, 4 }
  0xff   :  { %v294_v20 = vrot.slane %v293_v18, 2  ;;  %v330_v22 = vadd.f32 %v329_v15, %v328_v17 }
 0x101   :  { %v295_v21 = vadd.f32 %v294_v20, %v293_v18  ;;  %v331_v23 = vrot.slane %v330_v22, 2 }
 0x103   :  { %v296_v25 = vrot.slane %v295_v21, 1  ;;  %v332_v26 = vadd.f32 %v331_v23, %v330_v22 }
 0x105   :  { %v297_v27 = vadd.f32 %v296_v25, %v295_v21  ;;  %v333_v28 = vrot.slane %v332_v26, 1 }
 0x107   :  { %v334_v29 = vadd.f32 %v333_v28, %v332_v26  ;;  %v338_v30 = vsel %vm337_vm2, %v297_v27, 0.0 }
 0x109   :  { %v340_v31 = vsel %vm339_vm3, %v334_v29, 0.0 }
 0x10a   :  { %v341_v32 = vadd.f32 %v340_v31, %v338_v30 }
 0x10c   :  { %342 = vst [vmem:[%s570_s3] sm:$0xff] %v341_v32 }

// kernel: basic_block_forward.9
= control target key start
LH: loop header
LB: loop body
LE: loop exit
PB: predicated region body
PF: predicated region fallthrough
CT: control target
= control target key end

     0   :  { %s528_s0 = inlined_call_operand.vmem [shape: bf16[128,128], index: 0, kind: input, shape index: {}]   ;;  %s529_s1 = inlined_call_operand.vmem [shape: f32[1,128], index: 1, kind: input, shape index: {}]   ;;  %s530_s2 = inlined_call_operand.vmem [shape: f32[1,128], index: 2, kind: input, shape index: {}]   ;;  %s531_s3 = inlined_call_operand.vmem [shape: bf16[128,128], index: 3, kind: input, shape index: {}]   ;;  %s532_s4 = inlined_call_operand.vmem [shape: f32[1,128], index: 4, kind: input, shape index: {}]   ;;  %s533_s5 = inlined_call_operand.vmem [shape: f32[1,128], index: 5, kind: input, shape index: {}]   ;;  %s534_s6 = inlined_call_operand.vmem [shape: f32[128,128], index: 6, kind: output, shape index: {}]  }
   0x1   :  { %v236_v0 = vld [vmem:[%s528_s0] sm:$0xff]   ;;  %v299_v9 = vld [vmem:[%s528_s0 + $0x8] sm:$0xff]   ;;  %v300_v15 = vld [vmem:[%s528_s0 + $0x10] sm:$0xff]  }
   0x2   :  { %v354_v1 = vld [vmem:[%s529_s1] ss:$0 sm:$0xff]  ;;  %v237_v2 = vunpack.c.l.bf16 %v236_v0  ;;  %v238_v5 = vunpack.c.h.bf16 %v236_v0  ;;  %v306_v10 = vld [vmem:[%s531_s3 + $0x8] sm:$0xff]   ;;  %v241_v13 = vunpack.c.l.bf16 %v299_v9  ;;  %v307_v16 = vld [vmem:[%s531_s3 + $0x10] sm:$0xff]   ;;  %v242_v19 = vunpack.c.h.bf16 %v299_v9 }
   0x3   :  { %v268_v3 = vld [vmem:[%s531_s3] sm:$0xff]   ;;  %v273_v14 = vunpack.c.l.bf16 %v306_v10  ;;  %v274_v20 = vunpack.c.h.bf16 %v306_v10  ;;  %v245_v28 = vunpack.c.l.bf16 %v300_v15  ;;  %v277_v29 = vunpack.c.l.bf16 %v307_v16  ;;  %v301_v34 = vld [vmem:[%s528_s0 + $0x18] sm:$0xff]   ;;  %v303_v9 = vld [vmem:[%s528_s0 + $0x28] sm:$0xff]  }
   0x4   :  { %v362_v4 = vld [vmem:[%s532_s4] ss:$0 sm:$0xff]  ;;  %v269_v7 = vunpack.c.l.bf16 %v268_v3  ;;  %v270_v8 = vunpack.c.h.bf16 %v268_v3  ;;  %v62_v11 = vmul.f32 %v237_v2, %v354_v1  ;;  %v63_v12 = vmul.f32 %v238_v5, %v354_v1  ;;  %v308_v43 = vld [vmem:[%s531_s3 + $0x18] sm:$0xff]  }
   0x5   :  { %v367_v6 = vld [vmem:[%s530_s2] ss:$0 sm:$0xff]  ;;  %v64_v23 = vmul.f32 %v241_v13, %v354_v1  ;;  %v142_v24 = vmul.f32 %v273_v14, %v362_v4  ;;  %v65_v26 = vmul.f32 %v242_v19, %v354_v1  ;;  %v143_v27 = vmul.f32 %v274_v20, %v362_v4  ;;  %v310_v14 = vld [vmem:[%s531_s3 + $0x28] sm:$0xff]  }
   0x6   :  { %v140_v17 = vmul.f32 %v269_v7, %v362_v4  ;;  %v141_v18 = vmul.f32 %v270_v8, %v362_v4  ;;  %v85_v21 = vadd.f32 %v367_v6, %v62_v11  ;;  %v86_v22 = vadd.f32 %v367_v6, %v63_v12  ;;  %v392_v25 = vld [vmem:[%s533_s5] ss:$0 sm:$0xff] }
   0x7   :  { %v87_v32 = vadd.f32 %v367_v6, %v64_v23  ;;  %v246_v33 = vunpack.c.h.bf16 %v300_v15  ;;  %v88_v35 = vadd.f32 %v367_v6, %v65_v26  ;;  %v66_v36 = vmul.f32 %v245_v28, %v354_v1  ;;  %v302_v56 = vld [vmem:[%s528_s0 + $0x20] sm:$0xff]   ;;  %v304_v28 = vld [vmem:[%s528_s0 + $0x30] sm:$0xff]  }
   0x8   :  { %v156_v30 = vadd.f32 %v140_v17, %v85_v21  ;;  %v157_v31 = vadd.f32 %v141_v18, %v86_v22  ;;  %v144_v37 = vmul.f32 %v277_v29, %v362_v4  ;;  %v278_v38 = vunpack.c.h.bf16 %v307_v16  ;;  %v309_v61 = vld [vmem:[%s531_s3 + $0x20] sm:$0xff]  }
   0x9   :  { %v158_v41 = vadd.f32 %v142_v24, %v87_v32  ;;  %v67_v42 = vmul.f32 %v246_v33, %v354_v1  ;;  %v159_v44 = vadd.f32 %v143_v27, %v88_v35  ;;  %v89_v45 = vadd.f32 %v367_v6, %v66_v36  ;;  %v311_v33 = vld [vmem:[%s531_s3 + $0x30] sm:$0xff]  }
   0xa   :  { %v179_v39 = vadd.f32 %v392_v25, %v156_v30  ;;  %v180_v40 = vadd.f32 %v392_v25, %v157_v31  ;;  %v145_v46 = vmul.f32 %v278_v38, %v362_v4  ;;  %v249_v47 = vunpack.c.l.bf16 %v301_v34 }
   0xb   :  { %v181_v50 = vadd.f32 %v392_v25, %v158_v41  ;;  %v90_v51 = vadd.f32 %v367_v6, %v67_v42  ;;  %v182_v52 = vadd.f32 %v392_v25, %v159_v44  ;;  %v160_v53 = vadd.f32 %v144_v37, %v89_v45 }
   0xc   :  { %v195_v48 = vmax.f32 %v179_v39, 0.0  ;;  %v196_v49 = vmax.f32 %v180_v40, 0.0  ;;  %v68_v54 = vmul.f32 %v249_v47, %v354_v1  ;;  %v281_v55 = vunpack.c.l.bf16 %v308_v43 }
   0xd   :  { %v197_v57 = vmax.f32 %v181_v50, 0.0  ;;  %v161_v58 = vadd.f32 %v145_v46, %v90_v51  ;;  %v250_v59 = vunpack.c.h.bf16 %v301_v34  ;;  %v282_v60 = vunpack.c.h.bf16 %v308_v43  ;;  %v305_v50 = vld [vmem:[%s528_s0 + $0x38] sm:$0xff]  }
   0xe   :  { %211 = vst [vmem:[%s534_s6] sm:$0xff] %v195_v48  ;;  %212 = vst [vmem:[%s534_s6 + $0x8] sm:$0xff] %v196_v49  ;;  %v198_v62 = vmax.f32 %v182_v52, 0.0  ;;  %v183_v63 = vadd.f32 %v392_v25, %v160_v53  ;;  %v91_v0 = vadd.f32 %v367_v6, %v68_v54  ;;  %v146_v2 = vmul.f32 %v281_v55, %v362_v4  ;;  %v312_v51 = vld [vmem:[%s531_s3 + $0x38] sm:$0xff]  }
   0xf   :  { %213 = vst [vmem:[%s534_s6 + $0x10] sm:$0xff] %v197_v57  ;;  %v184_v3 = vadd.f32 %v392_v25, %v161_v58  ;;  %v69_v5 = vmul.f32 %v250_v59, %v354_v1  ;;  %v147_v7 = vmul.f32 %v282_v60, %v362_v4  ;;  %v253_v8 = vunpack.c.l.bf16 %v302_v56 }
  0x10   :  { %214 = vst [vmem:[%s534_s6 + $0x18] sm:$0xff] %v198_v62  ;;  %v199_v10 = vmax.f32 %v183_v63, 0.0  ;;  %v162_v11 = vadd.f32 %v146_v2, %v91_v0  ;;  %v285_v12 = vunpack.c.l.bf16 %v309_v61  ;;  %v254_v13 = vunpack.c.h.bf16 %v302_v56 }
  0x11   :  { %v200_v15 = vmax.f32 %v184_v3, 0.0  ;;  %v92_v16 = vadd.f32 %v367_v6, %v69_v5  ;;  %v70_v17 = vmul.f32 %v253_v8, %v354_v1  ;;  %v286_v18 = vunpack.c.h.bf16 %v309_v61 }
  0x12   :  { %215 = vst [vmem:[%s534_s6 + $0x20] sm:$0xff] %v199_v10  ;;  %v185_v19 = vadd.f32 %v392_v25, %v162_v11  ;;  %v148_v20 = vmul.f32 %v285_v12, %v362_v4  ;;  %v71_v21 = vmul.f32 %v254_v13, %v354_v1  ;;  %v257_v22 = vunpack.c.l.bf16 %v303_v9 }
  0x13   :  { %216 = vst [vmem:[%s534_s6 + $0x28] sm:$0xff] %v200_v15  ;;  %v163_v23 = vadd.f32 %v147_v7, %v92_v16  ;;  %v93_v24 = vadd.f32 %v367_v6, %v70_v17  ;;  %v149_v26 = vmul.f32 %v286_v18, %v362_v4  ;;  %v289_v27 = vunpack.c.l.bf16 %v310_v14 }
  0x14   :  { %v201_v29 = vmax.f32 %v185_v19, 0.0  ;;  %v94_v30 = vadd.f32 %v367_v6, %v71_v21  ;;  %v72_v31 = vmul.f32 %v257_v22, %v354_v1  ;;  %v258_v32 = vunpack.c.h.bf16 %v303_v9 }
  0x15   :  { %v186_v34 = vadd.f32 %v392_v25, %v163_v23  ;;  %v164_v35 = vadd.f32 %v148_v20, %v93_v24  ;;  %v150_v36 = vmul.f32 %v289_v27, %v362_v4  ;;  %v290_v37 = vunpack.c.h.bf16 %v310_v14 }
  0x16   :  { %217 = vst [vmem:[%s534_s6 + $0x30] sm:$0xff] %v201_v29  ;;  %v165_v38 = vadd.f32 %v149_v26, %v94_v30  ;;  %v95_v39 = vadd.f32 %v367_v6, %v72_v31  ;;  %v73_v40 = vmul.f32 %v258_v32, %v354_v1  ;;  %v261_v41 = vunpack.c.l.bf16 %v304_v28 }
  0x17   :  { %v202_v42 = vmax.f32 %v186_v34, 0.0  ;;  %v187_v43 = vadd.f32 %v392_v25, %v164_v35  ;;  %v151_v44 = vmul.f32 %v290_v37, %v362_v4  ;;  %v293_v45 = vunpack.c.l.bf16 %v311_v33 }
  0x18   :  { %v188_v46 = vadd.f32 %v392_v25, %v165_v38  ;;  %v166_v47 = vadd.f32 %v150_v36, %v95_v39  ;;  %v96_v48 = vadd.f32 %v367_v6, %v73_v40  ;;  %v74_v49 = vmul.f32 %v261_v41, %v354_v1 }
  0x19   :  { %218 = vst [vmem:[%s534_s6 + $0x38] sm:$0xff] %v202_v42  ;;  %v203_v52 = vmax.f32 %v187_v43, 0.0  ;;  %v152_v53 = vmul.f32 %v293_v45, %v362_v4  ;;  %v262_v54 = vunpack.c.h.bf16 %v304_v28  ;;  %v294_v55 = vunpack.c.h.bf16 %v311_v33 }
  0x1a   :  { %v204_v56 = vmax.f32 %v188_v46, 0.0  ;;  %v189_v57 = vadd.f32 %v392_v25, %v166_v47  ;;  %v167_v58 = vadd.f32 %v151_v44, %v96_v48  ;;  %v97_v59 = vadd.f32 %v367_v6, %v74_v49 }
  0x1b   :  { %219 = vst [vmem:[%s534_s6 + $0x40] sm:$0xff] %v203_v52  ;;  %v75_v60 = vmul.f32 %v262_v54, %v354_v1  ;;  %v153_v61 = vmul.f32 %v294_v55, %v362_v4  ;;  %v265_v62 = vunpack.c.l.bf16 %v305_v50  ;;  %v297_v63 = vunpack.c.l.bf16 %v312_v51 }
  0x1c   :  { %220 = vst [vmem:[%s534_s6 + $0x48] sm:$0xff] %v204_v56  ;;  %v205_v0 = vmax.f32 %v189_v57, 0.0  ;;  %v190_v2 = vadd.f32 %v392_v25, %v167_v58  ;;  %v168_v3 = vadd.f32 %v152_v53, %v97_v59  ;;  %v266_v5 = vunpack.c.h.bf16 %v305_v50 }
  0x1d   :  { %v98_v7 = vadd.f32 %v367_v6, %v75_v60  ;;  %v76_v8 = vmul.f32 %v265_v62, %v354_v1  ;;  %v154_v9 = vmul.f32 %v297_v63, %v362_v4  ;;  %v298_v10 = vunpack.c.h.bf16 %v312_v51 }
  0x1e   :  { %221 = vst [vmem:[%s534_s6 + $0x50] sm:$0xff] %v205_v0  ;;  %v206_v11 = vmax.f32 %v190_v2, 0.0  ;;  %v191_v12 = vadd.f32 %v392_v25, %v168_v3  ;;  %v77_v13 = vmul.f32 %v266_v5, %v354_v1 }
  0x1f   :  { %v169_v14 = vadd.f32 %v153_v61, %v98_v7  ;;  %v99_v15 = vadd.f32 %v367_v6, %v76_v8  ;;  %v155_v16 = vmul.f32 %v298_v10, %v362_v4 }
  0x20   :  { %222 = vst [vmem:[%s534_s6 + $0x58] sm:$0xff] %v206_v11  ;;  %v207_v17 = vmax.f32 %v191_v12, 0.0  ;;  %v100_v18 = vadd.f32 %v367_v6, %v77_v13 }
  0x21   :  { %v192_v19 = vadd.f32 %v392_v25, %v169_v14  ;;  %v170_v20 = vadd.f32 %v154_v9, %v99_v15 }
  0x22   :  { %223 = vst [vmem:[%s534_s6 + $0x60] sm:$0xff] %v207_v17  ;;  %v171_v1 = vadd.f32 %v155_v16, %v100_v18 }
  0x23   :  { %v208_v21 = vmax.f32 %v192_v19, 0.0  ;;  %v193_v22 = vadd.f32 %v392_v25, %v170_v20 }
  0x24   :  { %v194_v4 = vadd.f32 %v392_v25, %v171_v1 }
  0x25   :  { %224 = vst [vmem:[%s534_s6 + $0x68] sm:$0xff] %v208_v21  ;;  %v209_v23 = vmax.f32 %v193_v22, 0.0 }
  0x26   :  { %v210_v24 = vmax.f32 %v194_v4, 0.0 }
  0x27   :  { %225 = vst [vmem:[%s534_s6 + $0x70] sm:$0xff] %v209_v23 }
  0x28   :  { %226 = vst [vmem:[%s534_s6 + $0x78] sm:$0xff] %v210_v24 }

</bundles_post_ra>
